<compile_context>
chip_gen: v7x
topology: tpu7x:2x2x1
jax: 0.10.0
libtpu: 0.0.40
codegen_flags: <defaults>
</compile_context>

<pallas_src>
import functools

import jax
import jax.numpy as jnp
from jax.experimental import pallas as pl
from jax.experimental.pallas import tpu as pltpu  # noqa: F401  (kept for TPU-specific tuning)


def _batchnorm_kernel(x_ref, gamma_ref, beta_ref, o_ref, *, eps, count):
    # x_ref: (C, L) single VMEM block; gamma_ref / beta_ref: (C, 1)
    inv_count = 1.0 / count

    # Pass 1: per-channel mean (lane-axis reduction).
    mean = jnp.sum(x_ref[...].astype(jnp.float32), axis=1, keepdims=True) * inv_count

    # Pass 2: biased variance via (x - mean)^2 (numerically safe; block is
    # VMEM-resident so the re-read is nearly free).
    centered = x_ref[...].astype(jnp.float32) - mean
    var = jnp.sum(centered * centered, axis=1, keepdims=True) * inv_count

    inv_std = jax.lax.rsqrt(var + eps)                      # EUP slot
    scale = gamma_ref[...].astype(jnp.float32) * inv_std    # (C, 1)
    shift = beta_ref[...].astype(jnp.float32) - mean * scale

    # Final per-element FMA; re-index x_ref instead of reusing a live value.
    o_ref[...] = (x_ref[...].astype(jnp.float32) * scale + shift).astype(o_ref.dtype)


def batchnorm2d(x_nchw, gamma, beta, eps=1e-5):
    N, C, H, W = x_nchw.shape
    L = N * H * W

    if N == 1:
        x2 = x_nchw.reshape(C, H * W)  # free reshape, no transpose / HBM copy
    else:
        # TODO(synk): N > 1 path does an HBM transpose; a grid-tiled (N, C, HW)
        # variant avoids it for large activations.
        x2 = jnp.moveaxis(x_nchw, 1, 0).reshape(C, L)

    gamma2 = gamma.reshape(C, 1).astype(jnp.float32)
    beta2 = beta.reshape(C, 1).astype(jnp.float32)

    kernel = functools.partial(_batchnorm_kernel, eps=eps, count=float(L))

    cost = pl.CostEstimate(
        flops=5 * C * L,                                    # sum, center, square-sum, FMA
        transcendentals=C,                                  # one rsqrt per channel
        bytes_accessed=2 * C * L * x_nchw.dtype.itemsize + 2 * C * 4,
    )

    # Single full-tensor block: grid = (), no per-step overhead, one DMA in /
    # one DMA out, gamma/beta loaded once.
    y2 = pl.pallas_call(
        kernel,
        out_shape=jax.ShapeDtypeStruct((C, L), x_nchw.dtype),
        in_specs=[
            pl.BlockSpec((C, L), lambda: (0, 0)),
            pl.BlockSpec((C, 1), lambda: (0, 0)),
            pl.BlockSpec((C, 1), lambda: (0, 0)),
        ],
        out_specs=pl.BlockSpec((C, L), lambda: (0, 0)),
        cost_estimate=cost,
    )(x2, gamma2, beta2)

    if N == 1:
        return y2.reshape(N, C, H, W)
    return jnp.moveaxis(y2.reshape(C, N, H, W), 0, 1)


def reference_batchnorm(x, gamma, beta, eps=1e-5):
    # pure-JAX reference of training-mode BatchNorm2d (biased batch variance)
    mean = jnp.mean(x, axis=(0, 2, 3), keepdims=True)
    var = jnp.mean((x - mean) ** 2, axis=(0, 2, 3), keepdims=True)
    g = gamma.reshape(1, -1, 1, 1)
    b = beta.reshape(1, -1, 1, 1)
    return (x - mean) / jnp.sqrt(var + eps) * g + b


if __name__ == "__main__":
    key = jax.random.PRNGKey(0)
    N, C, H, W = 1, 440, 7, 7   # matches the module spec (BatchNorm2d(440))
    x = jax.random.normal(key, (N, C, H, W), dtype=jnp.float32)

    # PyTorch BatchNorm2d default affine init: weight = 1, bias = 0
    gamma = jnp.ones((C,), dtype=jnp.float32)
    beta = jnp.zeros((C,), dtype=jnp.float32)

    y = batchnorm2d(x, gamma, beta, eps=1e-5)
    y = jax.block_until_ready(y)

    y_ref = reference_batchnorm(x, gamma, beta, eps=1e-5)
    assert y.shape == (N, C, H, W)
    assert jnp.max(jnp.abs(y - y_ref)) < 1e-4

    print("KERNEL_OK")
</pallas_src>

<mosaic_0001>
module attributes {stable_mosaic.version = 11 : i64} {
  func.func @_batchnorm_kernel(%arg0: memref<440x49xf32, #tpu.memory_space<vmem>>, %arg1: memref<440x1xf32, #tpu.memory_space<vmem>>, %arg2: memref<440x1xf32, #tpu.memory_space<vmem>>, %arg3: memref<440x49xf32, #tpu.memory_space<vmem>>) attributes {dimension_semantics = [], scalar_prefetch = 0 : i64, scratch_operands = 0 : i64, tpu.core_type = #tpu.core_type<tc>} {
    %c0 = arith.constant 0 : index
    %c0_0 = arith.constant 0 : index
    %0 = vector.load %arg0[%c0, %c0_0] : memref<440x49xf32, #tpu.memory_space<vmem>>, vector<440x49xf32>
    %cst = arith.constant dense<0.000000e+00> : vector<440xf32>
    %1 = vector.multi_reduction <add>, %0, %cst [1] : vector<440x49xf32> to vector<440xf32>
    %2 = vector.shape_cast %1 : vector<440xf32> to vector<440x1xf32>
    %cst_1 = arith.constant 0.0204081628 : f32
    %3 = vector.broadcast %cst_1 : f32 to vector<440x1xf32>
    %4 = arith.mulf %2, %3 : vector<440x1xf32>
    %c0_2 = arith.constant 0 : index
    %c0_3 = arith.constant 0 : index
    %5 = vector.load %arg0[%c0_2, %c0_3] : memref<440x49xf32, #tpu.memory_space<vmem>>, vector<440x49xf32>
    %6 = vector.broadcast %4 : vector<440x1xf32> to vector<440x49xf32>
    %7 = arith.subf %5, %6 : vector<440x49xf32>
    %8 = arith.mulf %7, %7 : vector<440x49xf32>
    %cst_4 = arith.constant dense<0.000000e+00> : vector<440xf32>
    %9 = vector.multi_reduction <add>, %8, %cst_4 [1] : vector<440x49xf32> to vector<440xf32>
    %10 = vector.shape_cast %9 : vector<440xf32> to vector<440x1xf32>
    %cst_5 = arith.constant 0.0204081628 : f32
    %11 = vector.broadcast %cst_5 : f32 to vector<440x1xf32>
    %12 = arith.mulf %10, %11 : vector<440x1xf32>
    %cst_6 = arith.constant 9.99999974E-6 : f32
    %13 = vector.broadcast %cst_6 : f32 to vector<440x1xf32>
    %14 = arith.addf %12, %13 : vector<440x1xf32>
    %15 = math.rsqrt %14 : vector<440x1xf32>
    %c0_7 = arith.constant 0 : index
    %c0_8 = arith.constant 0 : index
    %16 = vector.load %arg1[%c0_7, %c0_8] : memref<440x1xf32, #tpu.memory_space<vmem>>, vector<440x1xf32>
    %17 = arith.mulf %16, %15 : vector<440x1xf32>
    %c0_9 = arith.constant 0 : index
    %c0_10 = arith.constant 0 : index
    %18 = vector.load %arg2[%c0_9, %c0_10] : memref<440x1xf32, #tpu.memory_space<vmem>>, vector<440x1xf32>
    %19 = arith.mulf %4, %17 : vector<440x1xf32>
    %20 = arith.subf %18, %19 : vector<440x1xf32>
    %c0_11 = arith.constant 0 : index
    %c0_12 = arith.constant 0 : index
    %21 = vector.load %arg0[%c0_11, %c0_12] : memref<440x49xf32, #tpu.memory_space<vmem>>, vector<440x49xf32>
    %22 = vector.broadcast %17 : vector<440x1xf32> to vector<440x49xf32>
    %23 = arith.mulf %21, %22 : vector<440x49xf32>
    %24 = vector.broadcast %20 : vector<440x1xf32> to vector<440x49xf32>
    %25 = arith.addf %23, %24 : vector<440x49xf32>
    %c0_13 = arith.constant 0 : index
    %c0_14 = arith.constant 0 : index
    %26 = vector.load %arg3[%c0_13, %c0_14] : memref<440x49xf32, #tpu.memory_space<vmem>>, vector<440x49xf32>
    tpu.vector_store %arg3[%c0_13, %c0_14], %25 {strides = array<i32>} : memref<440x49xf32, #tpu.memory_space<vmem>>, vector<440x49xf32>,
    return
  }
}

</mosaic_0001>

<bundles_post_ra>
// kernel: tpu_custom_call.1
= control target key start
LH: loop header
LB: loop body
LE: loop exit
PB: predicated region body
PF: predicated region fallthrough
CT: control target
= control target key end

     0   :  { %vm69_vm0 = vcmask 400384   ;;  %s3728_s0 = inlined_call_operand.vmem [shape: f32[440,49], index: 0, kind: input, shape index: {}]   ;;  %s3729_s1 = inlined_call_operand.vmem [shape: f32[440,1], index: 1, kind: input, shape index: {}]   ;;  %s3730_s2 = inlined_call_operand.vmem [shape: f32[440,1], index: 2, kind: input, shape index: {}]   ;;  %s3731_s3 = inlined_call_operand.vmem [shape: f32[440,49], index: 3, kind: output, shape index: {}]  }
   0x1   :  { %v1916_v0 = vld [vmem:[%s3728_s0] sm:$0xff]  ;;  %v1921_v1 = vld [vmem:[%s3728_s0 + $0x10] sm:$0xff]  ;;  %v1926_v2 = vld [vmem:[%s3728_s0 + $0x8] sm:$0xff] }
   0x2   :  { %v70_v3 = vsel %vm69_vm0, %v1916_v0, 0.0  ;;  %v76_v4 = vsel %vm69_vm0, %v1921_v1, 0.0  ;;  %v1935_v5 = vld [vmem:[%s3728_s0 + $0x18] sm:$0xff]  ;;  %v73_v6 = vsel %vm69_vm0, %v1926_v2, 0.0  ;;  %v1944_v8 = vld [vmem:[%s3728_s0 + $0x20] sm:$0xff]  ;;  %v1949_v9 = vld [vmem:[%s3728_s0 + $0x28] sm:$0xff] }
   0x3   :  { %71 = vadd.xlane.f32.xlu0 %v70_v3  ;;  %77 = vadd.xlane.f32.xlu1 %v76_v4  ;;  %v79_v7 = vsel %vm69_vm0, %v1935_v5, 0.0  ;;  %v82_v10 = vsel %vm69_vm0, %v1944_v8, 0.0  ;;  %v85_v11 = vsel %vm69_vm0, %v1949_v9, 0.0  ;;  %v1958_v12 = vld [vmem:[%s3728_s0 + $0x30] sm:$0xff]  ;;  %v1963_v13 = vld [vmem:[%s3728_s0 + $0x38] sm:$0xff]  ;;  %v1972_v16 = vld [vmem:[%s3728_s0 + $0x40] sm:$0xff] }
   0x4   :  { %v88_v14 = vsel %vm69_vm0, %v1958_v12, 0.0  ;;  %v91_v15 = vsel %vm69_vm0, %v1963_v13, 0.0  ;;  %v1977_v17 = vld [vmem:[%s3728_s0 + $0x48] sm:$0xff]  ;;  %v94_v18 = vsel %vm69_vm0, %v1972_v16, 0.0  ;;  %v1986_v20 = vld [vmem:[%s3728_s0 + $0x50] sm:$0xff]  ;;  %v1991_v21 = vld [vmem:[%s3728_s0 + $0x58] sm:$0xff] }
   0x5   :  { %v97_v19 = vsel %vm69_vm0, %v1977_v17, 0.0  ;;  %v100_v22 = vsel %vm69_vm0, %v1986_v20, 0.0  ;;  %v103_v23 = vsel %vm69_vm0, %v1991_v21, 0.0  ;;  %v2000_v24 = vld [vmem:[%s3728_s0 + $0x60] sm:$0xff]  ;;  %v2005_v25 = vld [vmem:[%s3728_s0 + $0x68] sm:$0xff]  ;;  %v2014_v28 = vld [vmem:[%s3728_s0 + $0x70] sm:$0xff] }
   0x6   :  { %v106_v26 = vsel %vm69_vm0, %v2000_v24, 0.0  ;;  %v109_v27 = vsel %vm69_vm0, %v2005_v25, 0.0  ;;  %v2019_v29 = vld [vmem:[%s3728_s0 + $0x78] sm:$0xff]  ;;  %v112_v30 = vsel %vm69_vm0, %v2014_v28, 0.0  ;;  %v2028_v32 = vld [vmem:[%s3728_s0 + $0x80] sm:$0xff]  ;;  %v2033_v33 = vld [vmem:[%s3728_s0 + $0x88] sm:$0xff] }
   0x7   :  { %74 = vadd.xlane.f32.xlu0 %v73_v6  ;;  %80 = vadd.xlane.f32.xlu1 %v79_v7  ;;  %v115_v31 = vsel %vm69_vm0, %v2019_v29, 0.0  ;;  %v118_v34 = vsel %vm69_vm0, %v2028_v32, 0.0  ;;  %v121_v35 = vsel %vm69_vm0, %v2033_v33, 0.0  ;;  %v2042_v36 = vld [vmem:[%s3728_s0 + $0x90] sm:$0xff]  ;;  %v2047_v37 = vld [vmem:[%s3728_s0 + $0x98] sm:$0xff]  ;;  %v2056_v40 = vld [vmem:[%s3728_s0 + $0xa0] sm:$0xff] }
   0x8   :  { %v124_v38 = vsel %vm69_vm0, %v2042_v36, 0.0  ;;  %v127_v39 = vsel %vm69_vm0, %v2047_v37, 0.0  ;;  %v2061_v41 = vld [vmem:[%s3728_s0 + $0xa8] sm:$0xff]  ;;  %v130_v42 = vsel %vm69_vm0, %v2056_v40, 0.0  ;;  %v2070_v44 = vld [vmem:[%s3728_s0 + $0xb0] sm:$0xff]  ;;  %v2075_v45 = vld [vmem:[%s3728_s0 + $0xb8] sm:$0xff] }
   0x9   :  { %v133_v43 = vsel %vm69_vm0, %v2061_v41, 0.0  ;;  %v136_v46 = vsel %vm69_vm0, %v2070_v44, 0.0  ;;  %v139_v47 = vsel %vm69_vm0, %v2075_v45, 0.0  ;;  %v2084_v48 = vld [vmem:[%s3728_s0 + $0xc0] sm:$0xff]  ;;  %v2089_v49 = vld [vmem:[%s3728_s0 + $0xc8] sm:$0xff]  ;;  %v2098_v52 = vld [vmem:[%s3728_s0 + $0xd0] sm:$0xff] }
   0xa   :  { %v142_v50 = vsel %vm69_vm0, %v2084_v48, 0.0  ;;  %v145_v51 = vsel %vm69_vm0, %v2089_v49, 0.0  ;;  %v2103_v53 = vld [vmem:[%s3728_s0 + $0xd8] sm:$0xff]  ;;  %v148_v54 = vsel %vm69_vm0, %v2098_v52, 0.0  ;;  %v2112_v56 = vld [vmem:[%s3728_s0 + $0xe0] sm:$0xff]  ;;  %v2117_v57 = vld [vmem:[%s3728_s0 + $0xe8] sm:$0xff] }
   0xb   :  { %83 = vadd.xlane.f32.xlu0 %v82_v10  ;;  %86 = vadd.xlane.f32.xlu1 %v85_v11  ;;  %v151_v55 = vsel %vm69_vm0, %v2103_v53, 0.0  ;;  %v154_v58 = vsel %vm69_vm0, %v2112_v56, 0.0  ;;  %v157_v59 = vsel %vm69_vm0, %v2117_v57, 0.0  ;;  %v2126_v60 = vld [vmem:[%s3728_s0 + $0xf0] sm:$0xff]  ;;  %v2131_v61 = vld [vmem:[%s3728_s0 + $0xf8] sm:$0xff]  ;;  %v2140_v3 = vld [vmem:[%s3728_s0 + $0x100] sm:$0xff] }
   0xc   :  { %v160_v62 = vsel %vm69_vm0, %v2126_v60, 0.0  ;;  %v163_v63 = vsel %vm69_vm0, %v2131_v61, 0.0  ;;  %v2145_v4 = vld [vmem:[%s3728_s0 + $0x108] sm:$0xff]  ;;  %v166_v6 = vsel %vm69_vm0, %v2140_v3, 0.0  ;;  %v2154_v10 = vld [vmem:[%s3728_s0 + $0x110] sm:$0xff]  ;;  %v2159_v11 = vld [vmem:[%s3728_s0 + $0x118] sm:$0xff] }
   0xd   :  { %v169_v7 = vsel %vm69_vm0, %v2145_v4, 0.0 }
   0xf   :  { %89 = vadd.xlane.f32.xlu0 %v88_v14  ;;  %92 = vadd.xlane.f32.xlu1 %v91_v15  ;;  %v172_v14 = vsel %vm69_vm0, %v2154_v10, 0.0  ;;  %v175_v15 = vsel %vm69_vm0, %v2159_v11, 0.0 }
  0x13   :  { %95 = vadd.xlane.f32.xlu0 %v94_v18  ;;  %98 = vadd.xlane.f32.xlu1 %v97_v19  ;;  %v2168_v18 = vld [vmem:[%s3728_s0 + $0x120] sm:$0xff]  ;;  %v2173_v19 = vld [vmem:[%s3728_s0 + $0x128] sm:$0xff] }
  0x17   :  { %101 = vadd.xlane.f32.xlu0 %v100_v22  ;;  %104 = vadd.xlane.f32.xlu1 %v103_v23  ;;  %v178_v22 = vsel %vm69_vm0, %v2168_v18, 0.0  ;;  %v181_v23 = vsel %vm69_vm0, %v2173_v19, 0.0 }
  0x1b   :  { %107 = vadd.xlane.f32.xlu0 %v106_v26  ;;  %110 = vadd.xlane.f32.xlu1 %v109_v27  ;;  %v2182_v26 = vld [vmem:[%s3728_s0 + $0x130] sm:$0xff]  ;;  %v2187_v27 = vld [vmem:[%s3728_s0 + $0x138] sm:$0xff] }
  0x1f   :  { %113 = vadd.xlane.f32.xlu0 %v112_v30  ;;  %116 = vadd.xlane.f32.xlu1 %v115_v31  ;;  %v184_v30 = vsel %vm69_vm0, %v2182_v26, 0.0  ;;  %v187_v31 = vsel %vm69_vm0, %v2187_v27, 0.0 }
  0x23   :  { %119 = vadd.xlane.f32.xlu0 %v118_v34  ;;  %122 = vadd.xlane.f32.xlu1 %v121_v35  ;;  %v2196_v34 = vld [vmem:[%s3728_s0 + $0x140] sm:$0xff]  ;;  %v2201_v35 = vld [vmem:[%s3728_s0 + $0x148] sm:$0xff] }
  0x27   :  { %125 = vadd.xlane.f32.xlu0 %v124_v38  ;;  %128 = vadd.xlane.f32.xlu1 %v127_v39  ;;  %v190_v38 = vsel %vm69_vm0, %v2196_v34, 0.0  ;;  %v193_v39 = vsel %vm69_vm0, %v2201_v35, 0.0 }
  0x2b   :  { %131 = vadd.xlane.f32.xlu0 %v130_v42  ;;  %134 = vadd.xlane.f32.xlu1 %v133_v43  ;;  %v2210_v42 = vld [vmem:[%s3728_s0 + $0x150] sm:$0xff]  ;;  %v2215_v43 = vld [vmem:[%s3728_s0 + $0x158] sm:$0xff] }
  0x2f   :  { %137 = vadd.xlane.f32.xlu0 %v136_v46  ;;  %140 = vadd.xlane.f32.xlu1 %v139_v47  ;;  %v196_v46 = vsel %vm69_vm0, %v2210_v42, 0.0  ;;  %v199_v47 = vsel %vm69_vm0, %v2215_v43, 0.0 }
  0x33   :  { %143 = vadd.xlane.f32.xlu0 %v142_v50  ;;  %146 = vadd.xlane.f32.xlu1 %v145_v51  ;;  %v2224_v50 = vld [vmem:[%s3728_s0 + $0x160] sm:$0xff]  ;;  %v2229_v51 = vld [vmem:[%s3728_s0 + $0x168] sm:$0xff] }
  0x37   :  { %149 = vadd.xlane.f32.xlu0 %v148_v54  ;;  %152 = vadd.xlane.f32.xlu1 %v151_v55  ;;  %v202_v54 = vsel %vm69_vm0, %v2224_v50, 0.0  ;;  %v205_v55 = vsel %vm69_vm0, %v2229_v51, 0.0 }
  0x3b   :  { %155 = vadd.xlane.f32.xlu0 %v154_v58  ;;  %158 = vadd.xlane.f32.xlu1 %v157_v59  ;;  %v2238_v58 = vld [vmem:[%s3728_s0 + $0x170] sm:$0xff]  ;;  %v2243_v59 = vld [vmem:[%s3728_s0 + $0x178] sm:$0xff] }
  0x3f   :  { %161 = vadd.xlane.f32.xlu0 %v160_v62  ;;  %164 = vadd.xlane.f32.xlu1 %v163_v63  ;;  %v208_v62 = vsel %vm69_vm0, %v2238_v58, 0.0  ;;  %v211_v63 = vsel %vm69_vm0, %v2243_v59, 0.0 }
  0x43   :  { %167 = vadd.xlane.f32.xlu0 %v166_v6  ;;  %170 = vadd.xlane.f32.xlu1 %v169_v7  ;;  %v2252_v6 = vld [vmem:[%s3728_s0 + $0x180] sm:$0xff]  ;;  %v2257_v7 = vld [vmem:[%s3728_s0 + $0x188] sm:$0xff] }
  0x47   :  { %173 = vadd.xlane.f32.xlu0 %v172_v14  ;;  %176 = vadd.xlane.f32.xlu1 %v175_v15  ;;  %v214_v14 = vsel %vm69_vm0, %v2252_v6, 0.0  ;;  %v217_v15 = vsel %vm69_vm0, %v2257_v7, 0.0 }
  0x4b   :  { %179 = vadd.xlane.f32.xlu0 %v178_v22  ;;  %182 = vadd.xlane.f32.xlu1 %v181_v23  ;;  %v2266_v22 = vld [vmem:[%s3728_s0 + $0x190] sm:$0xff]  ;;  %v2271_v23 = vld [vmem:[%s3728_s0 + $0x198] sm:$0xff] }
  0x4c   :  { %3790 = vst [vmem:[#allocation2_spill] sm:$0xff] %v2271_v23 }
  0x4f   :  { %185 = vadd.xlane.f32.xlu0 %v184_v30  ;;  %188 = vadd.xlane.f32.xlu1 %v187_v31  ;;  %v220_v30 = vsel %vm69_vm0, %v2266_v22, 0.0  ;;  %v223_v31 = vsel %vm69_vm0, %v2271_v23, 0.0 }
  0x53   :  { %191 = vadd.xlane.f32.xlu0 %v190_v38  ;;  %194 = vadd.xlane.f32.xlu1 %v193_v39  ;;  %v2280_v38 = vld [vmem:[%s3728_s0 + $0x1a0] sm:$0xff]  ;;  %v2285_v39 = vld [vmem:[%s3728_s0 + $0x1a8] sm:$0xff] }
  0x54   :  { %3791 = vst [vmem:[#allocation3_spill] sm:$0xff] %v2280_v38  ;;  %3792 = vst [vmem:[#allocation4_spill] sm:$0xff] %v2285_v39 }
  0x57   :  { %197 = vadd.xlane.f32.xlu0 %v196_v46  ;;  %200 = vadd.xlane.f32.xlu1 %v199_v47  ;;  %v226_v46 = vsel %vm69_vm0, %v2280_v38, 0.0  ;;  %v229_v47 = vsel %vm69_vm0, %v2285_v39, 0.0 }
  0x5b   :  { %203 = vadd.xlane.f32.xlu0 %v202_v54  ;;  %206 = vadd.xlane.f32.xlu1 %v205_v55  ;;  %v2294_v54 = vld [vmem:[%s3728_s0 + $0x1b0] sm:$0xff] }
  0x5c   :  { %3793 = vst [vmem:[#allocation5_spill] sm:$0xff] %v2294_v54  ;;  %v232_v55 = vsel %vm69_vm0, %v2294_v54, 0.0 }
  0x5f   :  { %209 = vadd.xlane.f32.xlu0 %v208_v62  ;;  %212 = vadd.xlane.f32.xlu1 %v211_v63 }
  0x63   :  { %215 = vadd.xlane.f32.xlu0 %v214_v14  ;;  %218 = vadd.xlane.f32.xlu1 %v217_v15 }
  0x67   :  { %221 = vadd.xlane.f32.xlu0 %v220_v30  ;;  %224 = vadd.xlane.f32.xlu1 %v223_v31 }
  0x6b   :  { %227 = vadd.xlane.f32.xlu0 %v226_v46  ;;  %230 = vadd.xlane.f32.xlu1 %v229_v47 }
  0x6f   :  { %233 = vadd.xlane.f32.xlu0 %v232_v55 }
  0x90   :  { %v72_v62 = vpop.xlane.xlu0 %71  ;;  %v78_v63 = vpop.xlane.xlu1 %77 }
  0x91   :  { %v2298_v14 = vmul.f32 0.020408163, %v72_v62  ;;  %v2300_v15 = vmul.f32 0.020408163, %v78_v63 }
  0x93   :  { %3794 = vst [vmem:[#allocation6_spill] sm:$0xff] %v2298_v14  ;;  %3795 = vst [vmem:[#allocation7_spill] sm:$0xff] %v2300_v15  ;;  %v290_v30 = vsub.f32 %v1916_v0, %v2298_v14  ;;  %v292_v31 = vsub.f32 %v1921_v1, %v2300_v15 }
  0x94   :  { %v75_v39 = vpop.xlane.xlu0 %74  ;;  %v81_v38 = vpop.xlane.xlu1 %80 }
  0x95   :  { %v2306_v46 = vmul.f32 0.020408163, %v75_v39  ;;  %v2308_v47 = vmul.f32 0.020408163, %v81_v38  ;;  %v345_v54 = vmul.f32 %v290_v30, %v290_v30  ;;  %v347_v55 = vmul.f32 %v292_v31, %v292_v31 }
  0x97   :  { %v400_v23 = vsel %vm69_vm0, %v345_v54, 0.0  ;;  %v291_v62 = vsub.f32 %v1926_v2, %v2306_v46  ;;  %v293_v63 = vsub.f32 %v1935_v5, %v2308_v47  ;;  %v406_v1 = vsel %vm69_vm0, %v347_v55, 0.0 }
  0x98   :  { %401 = vadd.xlane.f32.xlu1 %v400_v23  ;;  %v84_v0 = vpop.xlane.xlu0 %83  ;;  %v87_v14 = vpop.xlane.xlu1 %86 }
  0x99   :  { %v2316_v15 = vmul.f32 0.020408163, %v84_v0  ;;  %v2318_v39 = vmul.f32 0.020408163, %v87_v14  ;;  %v346_v38 = vmul.f32 %v291_v62, %v291_v62  ;;  %v348_v30 = vmul.f32 %v293_v63, %v293_v63 }
  0x9b   :  { %v403_v31 = vsel %vm69_vm0, %v346_v38, 0.0  ;;  %v294_v54 = vsub.f32 %v1944_v8, %v2316_v15  ;;  %v295_v2 = vsub.f32 %v1949_v9, %v2318_v39  ;;  %v409_v55 = vsel %vm69_vm0, %v348_v30, 0.0 }
  0x9c   :  { %407 = vadd.xlane.f32.xlu1 %v406_v1  ;;  %404 = vadd.xlane.f32.xlu0 %v403_v31  ;;  %v90_v5 = vpop.xlane.xlu0 %89  ;;  %v93_v23 = vpop.xlane.xlu1 %92 }
  0x9d   :  { %v2326_v0 = vmul.f32 0.020408163, %v90_v5  ;;  %v2328_v14 = vmul.f32 0.020408163, %v93_v23  ;;  %v349_v62 = vmul.f32 %v294_v54, %v294_v54  ;;  %v350_v63 = vmul.f32 %v295_v2, %v295_v2 }
  0x9f   :  { %v412_v38 = vsel %vm69_vm0, %v349_v62, 0.0  ;;  %v296_v8 = vsub.f32 %v1958_v12, %v2326_v0  ;;  %v297_v9 = vsub.f32 %v1963_v13, %v2328_v14  ;;  %v415_v30 = vsel %vm69_vm0, %v350_v63, 0.0 }
  0xa0   :  { %410 = vadd.xlane.f32.xlu0 %v409_v55  ;;  %413 = vadd.xlane.f32.xlu1 %v412_v38  ;;  %v96_v1 = vpop.xlane.xlu0 %95  ;;  %v99_v31 = vpop.xlane.xlu1 %98 }
  0xa1   :  { %v2336_v5 = vmul.f32 0.020408163, %v96_v1  ;;  %v2338_v23 = vmul.f32 0.020408163, %v99_v31  ;;  %v351_v54 = vmul.f32 %v296_v8, %v296_v8  ;;  %v352_v2 = vmul.f32 %v297_v9, %v297_v9 }
  0xa3   :  { %v418_v62 = vsel %vm69_vm0, %v351_v54, 0.0  ;;  %v298_v12 = vsub.f32 %v1972_v16, %v2336_v5  ;;  %v299_v13 = vsub.f32 %v1977_v17, %v2338_v23  ;;  %v421_v63 = vsel %vm69_vm0, %v352_v2, 0.0 }
  0xa4   :  { %416 = vadd.xlane.f32.xlu0 %v415_v30  ;;  %419 = vadd.xlane.f32.xlu1 %v418_v62  ;;  %v102_v55 = vpop.xlane.xlu0 %101  ;;  %v105_v38 = vpop.xlane.xlu1 %104 }
  0xa5   :  { %v2346_v1 = vmul.f32 0.020408163, %v102_v55  ;;  %v2348_v31 = vmul.f32 0.020408163, %v105_v38  ;;  %v353_v8 = vmul.f32 %v298_v12, %v298_v12  ;;  %v354_v9 = vmul.f32 %v299_v13, %v299_v13 }
  0xa7   :  { %v424_v54 = vsel %vm69_vm0, %v353_v8, 0.0  ;;  %v300_v16 = vsub.f32 %v1986_v20, %v2346_v1  ;;  %v301_v17 = vsub.f32 %v1991_v21, %v2348_v31  ;;  %v427_v2 = vsel %vm69_vm0, %v354_v9, 0.0 }
  0xa8   :  { %422 = vadd.xlane.f32.xlu0 %v421_v63  ;;  %425 = vadd.xlane.f32.xlu1 %v424_v54  ;;  %v108_v30 = vpop.xlane.xlu0 %107  ;;  %v111_v62 = vpop.xlane.xlu1 %110 }
  0xa9   :  { %v2356_v55 = vmul.f32 0.020408163, %v108_v30  ;;  %v2358_v38 = vmul.f32 0.020408163, %v111_v62  ;;  %v355_v12 = vmul.f32 %v300_v16, %v300_v16  ;;  %v356_v13 = vmul.f32 %v301_v17, %v301_v17 }
  0xab   :  { %v430_v8 = vsel %vm69_vm0, %v355_v12, 0.0  ;;  %v302_v20 = vsub.f32 %v2000_v24, %v2356_v55  ;;  %v303_v21 = vsub.f32 %v2005_v25, %v2358_v38  ;;  %v433_v9 = vsel %vm69_vm0, %v356_v13, 0.0 }
  0xac   :  { %428 = vadd.xlane.f32.xlu0 %v427_v2  ;;  %431 = vadd.xlane.f32.xlu1 %v430_v8  ;;  %v114_v63 = vpop.xlane.xlu0 %113  ;;  %v117_v54 = vpop.xlane.xlu1 %116 }
  0xad   :  { %v2366_v30 = vmul.f32 0.020408163, %v114_v63  ;;  %v2368_v62 = vmul.f32 0.020408163, %v117_v54  ;;  %v357_v16 = vmul.f32 %v302_v20, %v302_v20  ;;  %v358_v17 = vmul.f32 %v303_v21, %v303_v21 }
  0xaf   :  { %v436_v12 = vsel %vm69_vm0, %v357_v16, 0.0  ;;  %v304_v24 = vsub.f32 %v2014_v28, %v2366_v30  ;;  %v305_v25 = vsub.f32 %v2019_v29, %v2368_v62  ;;  %v439_v13 = vsel %vm69_vm0, %v358_v17, 0.0 }
  0xb0   :  { %434 = vadd.xlane.f32.xlu0 %v433_v9  ;;  %437 = vadd.xlane.f32.xlu1 %v436_v12  ;;  %v120_v2 = vpop.xlane.xlu0 %119  ;;  %v123_v8 = vpop.xlane.xlu1 %122 }
  0xb1   :  { %v2376_v63 = vmul.f32 0.020408163, %v120_v2  ;;  %v2378_v54 = vmul.f32 0.020408163, %v123_v8  ;;  %v359_v20 = vmul.f32 %v304_v24, %v304_v24  ;;  %v360_v21 = vmul.f32 %v305_v25, %v305_v25 }
  0xb3   :  { %v442_v16 = vsel %vm69_vm0, %v359_v20, 0.0  ;;  %v306_v28 = vsub.f32 %v2028_v32, %v2376_v63  ;;  %v307_v29 = vsub.f32 %v2033_v33, %v2378_v54  ;;  %v445_v17 = vsel %vm69_vm0, %v360_v21, 0.0 }
  0xb4   :  { %440 = vadd.xlane.f32.xlu0 %v439_v13  ;;  %443 = vadd.xlane.f32.xlu1 %v442_v16  ;;  %v126_v9 = vpop.xlane.xlu0 %125  ;;  %v129_v12 = vpop.xlane.xlu1 %128  ;;  %v1892_v13 = vmov 0  }
  0xb5   :  { %v2386_v2 = vmul.f32 0.020408163, %v126_v9  ;;  %v2388_v8 = vmul.f32 0.020408163, %v129_v12  ;;  %v361_v24 = vmul.f32 %v306_v28, %v306_v28  ;;  %v362_v25 = vmul.f32 %v307_v29, %v307_v29  ;;  %1725 = vset.pattern.permute.xlu0 %v1892_v13  ;;  %1726 = vset.pattern.permute.xlu1 %v1892_v13 }
  0xb7   :  { %v448_v20 = vsel %vm69_vm0, %v361_v24, 0.0  ;;  %v308_v32 = vsub.f32 %v2042_v36, %v2386_v2  ;;  %v309_v33 = vsub.f32 %v2047_v37, %v2388_v8  ;;  %v451_v9 = vsel %vm69_vm0, %v362_v25, 0.0 }
  0xb8   :  { %446 = vadd.xlane.f32.xlu0 %v445_v17  ;;  %449 = vadd.xlane.f32.xlu1 %v448_v20  ;;  %v132_v21 = vpop.xlane.xlu0 %131  ;;  %v135_v16 = vpop.xlane.xlu1 %134 }
  0xb9   :  { %v2396_v12 = vmul.f32 0.020408163, %v132_v21  ;;  %v2398_v28 = vmul.f32 0.020408163, %v135_v16  ;;  %v363_v29 = vmul.f32 %v308_v32, %v308_v32  ;;  %v364_v24 = vmul.f32 %v309_v33, %v309_v33 }
  0xbb   :  { %3796 = vst [vmem:[#allocation8_spill] sm:$0xff] %v2398_v28  ;;  %v454_v36 = vsel %vm69_vm0, %v363_v29, 0.0  ;;  %v310_v37 = vsub.f32 %v2056_v40, %v2396_v12  ;;  %v311_v13 = vsub.f32 %v2061_v41, %v2398_v28  ;;  %v457_v25 = vsel %vm69_vm0, %v364_v24, 0.0 }
  0xbc   :  { %452 = vadd.xlane.f32.xlu0 %v451_v9  ;;  %455 = vadd.xlane.f32.xlu1 %v454_v36  ;;  %v138_v17 = vpop.xlane.xlu0 %137  ;;  %v141_v20 = vpop.xlane.xlu1 %140 }
  0xbd   :  { %v2406_v21 = vmul.f32 0.020408163, %v138_v17  ;;  %v2408_v16 = vmul.f32 0.020408163, %v141_v20  ;;  %v365_v32 = vmul.f32 %v310_v37, %v310_v37  ;;  %v366_v33 = vmul.f32 %v311_v13, %v311_v13 }
  0xbf   :  { %3797 = vst [vmem:[#allocation9_spill] sm:$0xff] %v2408_v16  ;;  %v460_v29 = vsel %vm69_vm0, %v365_v32, 0.0  ;;  %v312_v40 = vsub.f32 %v2070_v44, %v2406_v21  ;;  %v313_v41 = vsub.f32 %v2075_v45, %v2408_v16  ;;  %v463_v24 = vsel %vm69_vm0, %v366_v33, 0.0 }
  0xc0   :  { %458 = vadd.xlane.f32.xlu0 %v457_v25  ;;  %461 = vadd.xlane.f32.xlu1 %v460_v29  ;;  %v144_v9 = vpop.xlane.xlu0 %143  ;;  %v147_v36 = vpop.xlane.xlu1 %146 }
  0xc1   :  { %v2416_v17 = vmul.f32 0.020408163, %v144_v9  ;;  %v2418_v20 = vmul.f32 0.020408163, %v147_v36  ;;  %v367_v37 = vmul.f32 %v312_v40, %v312_v40  ;;  %v368_v13 = vmul.f32 %v313_v41, %v313_v41 }
  0xc3   :  { %3798 = vst [vmem:[#allocation10_spill] sm:$0xff] %v2418_v20  ;;  %v466_v32 = vsel %vm69_vm0, %v367_v37, 0.0  ;;  %v314_v44 = vsub.f32 %v2084_v48, %v2416_v17  ;;  %v315_v45 = vsub.f32 %v2089_v49, %v2418_v20  ;;  %v469_v33 = vsel %vm69_vm0, %v368_v13, 0.0 }
  0xc4   :  { %464 = vadd.xlane.f32.xlu0 %v463_v24  ;;  %467 = vadd.xlane.f32.xlu1 %v466_v32  ;;  %v150_v25 = vpop.xlane.xlu0 %149  ;;  %v153_v29 = vpop.xlane.xlu1 %152 }
  0xc5   :  { %v2426_v9 = vmul.f32 0.020408163, %v150_v25  ;;  %v2428_v36 = vmul.f32 0.020408163, %v153_v29  ;;  %v369_v40 = vmul.f32 %v314_v44, %v314_v44  ;;  %v370_v41 = vmul.f32 %v315_v45, %v315_v45 }
  0xc7   :  { %3799 = vst [vmem:[#allocation11_spill] sm:$0xff] %v2426_v9  ;;  %3800 = vst [vmem:[#allocation12_spill] sm:$0xff] %v2428_v36  ;;  %v472_v37 = vsel %vm69_vm0, %v369_v40, 0.0  ;;  %v316_v48 = vsub.f32 %v2098_v52, %v2426_v9  ;;  %v317_v49 = vsub.f32 %v2103_v53, %v2428_v36  ;;  %v475_v13 = vsel %vm69_vm0, %v370_v41, 0.0 }
  0xc8   :  { %470 = vadd.xlane.f32.xlu0 %v469_v33  ;;  %473 = vadd.xlane.f32.xlu1 %v472_v37  ;;  %v156_v24 = vpop.xlane.xlu0 %155  ;;  %v159_v32 = vpop.xlane.xlu1 %158 }
  0xc9   :  { %v2436_v25 = vmul.f32 0.020408163, %v156_v24  ;;  %v2438_v29 = vmul.f32 0.020408163, %v159_v32  ;;  %v371_v44 = vmul.f32 %v316_v48, %v316_v48  ;;  %v372_v45 = vmul.f32 %v317_v49, %v317_v49 }
  0xcb   :  { %3801 = vst [vmem:[#allocation13_spill] sm:$0xff] %v2436_v25  ;;  %3802 = vst [vmem:[#allocation14_spill] sm:$0xff] %v2438_v29  ;;  %v478_v40 = vsel %vm69_vm0, %v371_v44, 0.0  ;;  %v318_v52 = vsub.f32 %v2112_v56, %v2436_v25  ;;  %v319_v53 = vsub.f32 %v2117_v57, %v2438_v29  ;;  %v481_v41 = vsel %vm69_vm0, %v372_v45, 0.0 }
  0xcc   :  { %476 = vadd.xlane.f32.xlu0 %v475_v13  ;;  %479 = vadd.xlane.f32.xlu1 %v478_v40  ;;  %v162_v33 = vpop.xlane.xlu0 %161  ;;  %v165_v37 = vpop.xlane.xlu1 %164 }
  0xcd   :  { %v2446_v24 = vmul.f32 0.020408163, %v162_v33  ;;  %v2448_v32 = vmul.f32 0.020408163, %v165_v37  ;;  %v373_v48 = vmul.f32 %v318_v52, %v318_v52  ;;  %v374_v49 = vmul.f32 %v319_v53, %v319_v53 }
  0xcf   :  { %3803 = vst [vmem:[#allocation15_spill] sm:$0xff] %v2446_v24  ;;  %3804 = vst [vmem:[#allocation16_spill] sm:$0xff] %v2448_v32  ;;  %v484_v44 = vsel %vm69_vm0, %v373_v48, 0.0  ;;  %v320_v56 = vsub.f32 %v2126_v60, %v2446_v24  ;;  %v321_v57 = vsub.f32 %v2131_v61, %v2448_v32  ;;  %v487_v45 = vsel %vm69_vm0, %v374_v49, 0.0  ;;  %v755_v24 = vld [vmem:[%s3729_s1 + $0xc8] sm:$0xff] }
  0xd0   :  { %482 = vadd.xlane.f32.xlu0 %v481_v41  ;;  %485 = vadd.xlane.f32.xlu1 %v484_v44  ;;  %v168_v13 = vpop.xlane.xlu0 %167  ;;  %v171_v40 = vpop.xlane.xlu1 %170 }
  0xd1   :  { %v2456_v33 = vmul.f32 0.020408163, %v168_v13  ;;  %v2458_v37 = vmul.f32 0.020408163, %v171_v40  ;;  %v375_v52 = vmul.f32 %v320_v56, %v320_v56  ;;  %v376_v53 = vmul.f32 %v321_v57, %v321_v57 }
  0xd3   :  { %3805 = vst [vmem:[#allocation17_spill] sm:$0xff] %v2456_v33  ;;  %3806 = vst [vmem:[#allocation18_spill] sm:$0xff] %v2458_v37  ;;  %v490_v48 = vsel %vm69_vm0, %v375_v52, 0.0  ;;  %v322_v60 = vsub.f32 %v2140_v3, %v2456_v33  ;;  %v323_v61 = vsub.f32 %v2145_v4, %v2458_v37  ;;  %v493_v49 = vsel %vm69_vm0, %v376_v53, 0.0  ;;  %v753_v33 = vld [vmem:[%s3729_s1 + $0xb8] sm:$0xff] }
  0xd4   :  { %488 = vadd.xlane.f32.xlu0 %v487_v45  ;;  %491 = vadd.xlane.f32.xlu1 %v490_v48  ;;  %v174_v41 = vpop.xlane.xlu0 %173  ;;  %v177_v44 = vpop.xlane.xlu1 %176 }
  0xd5   :  { %v2466_v13 = vmul.f32 0.020408163, %v174_v41  ;;  %v2468_v40 = vmul.f32 0.020408163, %v177_v44  ;;  %v377_v56 = vmul.f32 %v322_v60, %v322_v60  ;;  %v378_v57 = vmul.f32 %v323_v61, %v323_v61 }
  0xd7   :  { %3807 = vst [vmem:[#allocation19_spill] sm:$0xff] %v2466_v13  ;;  %3808 = vst [vmem:[#allocation20_spill] sm:$0xff] %v2468_v40  ;;  %v496_v52 = vsel %vm69_vm0, %v377_v56, 0.0  ;;  %v324_v3 = vsub.f32 %v2154_v10, %v2466_v13  ;;  %v325_v4 = vsub.f32 %v2159_v11, %v2468_v40  ;;  %v499_v53 = vsel %vm69_vm0, %v378_v57, 0.0  ;;  %v751_v13 = vld [vmem:[%s3729_s1 + $0xa8] sm:$0xff] }
  0xd8   :  { %494 = vadd.xlane.f32.xlu0 %v493_v49  ;;  %497 = vadd.xlane.f32.xlu1 %v496_v52  ;;  %v180_v45 = vpop.xlane.xlu0 %179  ;;  %v183_v48 = vpop.xlane.xlu1 %182 }
  0xd9   :  { %v2476_v41 = vmul.f32 0.020408163, %v180_v45  ;;  %v2478_v44 = vmul.f32 0.020408163, %v183_v48  ;;  %v379_v60 = vmul.f32 %v324_v3, %v324_v3  ;;  %v380_v61 = vmul.f32 %v325_v4, %v325_v4 }
  0xdb   :  { %3809 = vst [vmem:[#allocation21_spill] sm:$0xff] %v2476_v41  ;;  %3810 = vst [vmem:[#allocation22_spill] sm:$0xff] %v2478_v44  ;;  %v502_v56 = vsel %vm69_vm0, %v379_v60, 0.0  ;;  %v326_v10 = vsub.f32 %v2168_v18, %v2476_v41  ;;  %v327_v11 = vsub.f32 %v2173_v19, %v2478_v44  ;;  %v505_v57 = vsel %vm69_vm0, %v380_v61, 0.0  ;;  %v749_v41 = vld [vmem:[%s3729_s1 + $0x98] sm:$0xff] }
  0xdc   :  { %500 = vadd.xlane.f32.xlu0 %v499_v53  ;;  %503 = vadd.xlane.f32.xlu1 %v502_v56  ;;  %v186_v49 = vpop.xlane.xlu0 %185  ;;  %v189_v52 = vpop.xlane.xlu1 %188 }
  0xdd   :  { %v2486_v45 = vmul.f32 0.020408163, %v186_v49  ;;  %v2488_v48 = vmul.f32 0.020408163, %v189_v52  ;;  %v381_v3 = vmul.f32 %v326_v10, %v326_v10  ;;  %v382_v4 = vmul.f32 %v327_v11, %v327_v11 }
  0xdf   :  { %3811 = vst [vmem:[#allocation23_spill] sm:$0xff] %v2486_v45  ;;  %3812 = vst [vmem:[#allocation24_spill] sm:$0xff] %v2488_v48  ;;  %v508_v60 = vsel %vm69_vm0, %v381_v3, 0.0  ;;  %v328_v18 = vsub.f32 %v2182_v26, %v2486_v45  ;;  %v329_v19 = vsub.f32 %v2187_v27, %v2488_v48  ;;  %v511_v61 = vsel %vm69_vm0, %v382_v4, 0.0  ;;  %v747_v45 = vld [vmem:[%s3729_s1 + $0x88] sm:$0xff] }
  0xe0   :  { %506 = vadd.xlane.f32.xlu0 %v505_v57  ;;  %509 = vadd.xlane.f32.xlu1 %v508_v60  ;;  %v192_v53 = vpop.xlane.xlu0 %191  ;;  %v195_v56 = vpop.xlane.xlu1 %194 }
  0xe1   :  { %v2496_v49 = vmul.f32 0.020408163, %v192_v53  ;;  %v2498_v52 = vmul.f32 0.020408163, %v195_v56  ;;  %v383_v10 = vmul.f32 %v328_v18, %v328_v18  ;;  %v384_v11 = vmul.f32 %v329_v19, %v329_v19 }
  0xe3   :  { %3813 = vst [vmem:[#allocation25_spill] sm:$0xff] %v2496_v49  ;;  %3814 = vst [vmem:[#allocation26_spill] sm:$0xff] %v2498_v52  ;;  %v514_v3 = vsel %vm69_vm0, %v383_v10, 0.0  ;;  %v330_v26 = vsub.f32 %v2196_v34, %v2496_v49  ;;  %v331_v27 = vsub.f32 %v2201_v35, %v2498_v52  ;;  %v517_v4 = vsel %vm69_vm0, %v384_v11, 0.0  ;;  %v745_v49 = vld [vmem:[%s3729_s1 + $0x78] sm:$0xff] }
  0xe4   :  { %512 = vadd.xlane.f32.xlu0 %v511_v61  ;;  %515 = vadd.xlane.f32.xlu1 %v514_v3  ;;  %v198_v57 = vpop.xlane.xlu0 %197  ;;  %v201_v60 = vpop.xlane.xlu1 %200 }
  0xe5   :  { %v2506_v53 = vmul.f32 0.020408163, %v198_v57  ;;  %v2508_v56 = vmul.f32 0.020408163, %v201_v60  ;;  %v385_v18 = vmul.f32 %v330_v26, %v330_v26  ;;  %v386_v19 = vmul.f32 %v331_v27, %v331_v27 }
  0xe7   :  { %3815 = vst [vmem:[#allocation27_spill] sm:$0xff] %v2506_v53  ;;  %3816 = vst [vmem:[#allocation28_spill] sm:$0xff] %v2508_v56  ;;  %v333_v10 = vsub.f32 %v2215_v43, %v2508_v56  ;;  %v520_v34 = vsel %vm69_vm0, %v385_v18, 0.0  ;;  %v332_v35 = vsub.f32 %v2210_v42, %v2506_v53  ;;  %v523_v11 = vsel %vm69_vm0, %v386_v19, 0.0  ;;  %v743_v53 = vld [vmem:[%s3729_s1 + $0x68] sm:$0xff] }
  0xe8   :  { %518 = vadd.xlane.f32.xlu0 %v517_v4  ;;  %521 = vadd.xlane.f32.xlu1 %v520_v34  ;;  %v204_v61 = vpop.xlane.xlu0 %203  ;;  %v207_v3 = vpop.xlane.xlu1 %206 }
  0xe9   :  { %v2516_v57 = vmul.f32 0.020408163, %v204_v61  ;;  %v2518_v60 = vmul.f32 0.020408163, %v207_v3  ;;  %v387_v26 = vmul.f32 %v332_v35, %v332_v35  ;;  %v388_v27 = vmul.f32 %v333_v10, %v333_v10 }
  0xeb   :  { %3817 = vst [vmem:[#allocation29_spill] sm:$0xff] %v2516_v57  ;;  %3818 = vst [vmem:[#allocation30_spill] sm:$0xff] %v2518_v60  ;;  %v334_v43 = vsub.f32 %v2224_v50, %v2516_v57  ;;  %v335_v18 = vsub.f32 %v2229_v51, %v2518_v60  ;;  %v526_v42 = vsel %vm69_vm0, %v387_v26, 0.0  ;;  %v529_v19 = vsel %vm69_vm0, %v388_v27, 0.0  ;;  %v3829_v60 = vld [vmem:[#allocation4_spill] sm:$0xff] }
  0xec   :  { %524 = vadd.xlane.f32.xlu0 %v523_v11  ;;  %527 = vadd.xlane.f32.xlu1 %v526_v42  ;;  %v210_v4 = vpop.xlane.xlu0 %209  ;;  %v213_v34 = vpop.xlane.xlu1 %212  ;;  %v736_v57 = vld [vmem:[%s3729_s1 + $0x30] sm:$0xff] }
  0xed   :  { %v2526_v61 = vmul.f32 0.020408163, %v210_v4  ;;  %v2528_v3 = vmul.f32 0.020408163, %v213_v34  ;;  %v389_v35 = vmul.f32 %v334_v43, %v334_v43  ;;  %v390_v10 = vmul.f32 %v335_v18, %v335_v18 }
  0xef   :  { %3819 = vst [vmem:[#allocation31_spill] sm:$0xff] %v2526_v61  ;;  %3820 = vst [vmem:[#allocation32_spill] sm:$0xff] %v2528_v3  ;;  %v336_v50 = vsub.f32 %v2238_v58, %v2526_v61  ;;  %v337_v51 = vsub.f32 %v2243_v59, %v2528_v3  ;;  %v532_v26 = vsel %vm69_vm0, %v389_v35, 0.0  ;;  %v535_v27 = vsel %vm69_vm0, %v390_v10, 0.0  ;;  %v3825_v3 = vld [vmem:[#allocation2_spill] sm:$0xff] }
  0xf0   :  { %530 = vadd.xlane.f32.xlu0 %v529_v19  ;;  %533 = vadd.xlane.f32.xlu1 %v532_v26  ;;  %v216_v11 = vpop.xlane.xlu0 %215  ;;  %v219_v42 = vpop.xlane.xlu1 %218 }
  0xf1   :  { %v2536_v4 = vmul.f32 0.020408163, %v216_v11  ;;  %v2538_v34 = vmul.f32 0.020408163, %v219_v42  ;;  %v391_v43 = vmul.f32 %v336_v50, %v336_v50  ;;  %v392_v18 = vmul.f32 %v337_v51, %v337_v51 }
  0xf3   :  { %3821 = vst [vmem:[#allocation33_spill] sm:$0xff] %v2536_v4  ;;  %3822 = vst [vmem:[#allocation34_spill] sm:$0xff] %v2538_v34  ;;  %v338_v58 = vsub.f32 %v2252_v6, %v2536_v4  ;;  %v339_v59 = vsub.f32 %v2257_v7, %v2538_v34  ;;  %v538_v35 = vsel %vm69_vm0, %v391_v43, 0.0  ;;  %v541_v10 = vsel %vm69_vm0, %v392_v18, 0.0  ;;  %v3828_v34 = vld [vmem:[#allocation3_spill] sm:$0xff] }
  0xf4   :  { %536 = vadd.xlane.f32.xlu0 %v535_v27  ;;  %539 = vadd.xlane.f32.xlu1 %v538_v35  ;;  %v222_v19 = vpop.xlane.xlu0 %221  ;;  %v225_v26 = vpop.xlane.xlu1 %224 }
  0xf5   :  { %v2546_v11 = vmul.f32 0.020408163, %v222_v19  ;;  %v2548_v42 = vmul.f32 0.020408163, %v225_v26  ;;  %v393_v50 = vmul.f32 %v338_v58, %v338_v58  ;;  %v394_v51 = vmul.f32 %v339_v59, %v339_v59 }
  0xf7   :  { %3823 = vst [vmem:[#allocation35_spill] sm:$0xff] %v2546_v11  ;;  %3824 = vst [vmem:[#allocation36_spill] sm:$0xff] %v2548_v42  ;;  %v340_v6 = vsub.f32 %v2266_v22, %v2546_v11  ;;  %v341_v7 = vsub.f32 %v3825_v3, %v2548_v42  ;;  %v544_v43 = vsel %vm69_vm0, %v393_v50, 0.0  ;;  %v547_v18 = vsel %vm69_vm0, %v394_v51, 0.0 }
  0xf8   :  { %542 = vadd.xlane.f32.xlu0 %v541_v10  ;;  %545 = vadd.xlane.f32.xlu1 %v544_v43  ;;  %v228_v27 = vpop.xlane.xlu0 %227  ;;  %v231_v35 = vpop.xlane.xlu1 %230 }
  0xf9   :  { %v2556_v19 = vmul.f32 0.020408163, %v228_v27  ;;  %v2558_v26 = vmul.f32 0.020408163, %v231_v35  ;;  %v395_v58 = vmul.f32 %v340_v6, %v340_v6  ;;  %v396_v59 = vmul.f32 %v341_v7, %v341_v7  ;;  %v3831_v6 = vld [vmem:[#allocation5_spill] sm:$0xff] }
  0xfb   :  { %3826 = vst [vmem:[#allocation2_spill] sm:$0xff] %v2556_v19  ;;  %3827 = vst [vmem:[#allocation37_spill] sm:$0xff] %v2558_v26  ;;  %v342_v22 = vsub.f32 %v3828_v34, %v2556_v19  ;;  %v343_v3 = vsub.f32 %v3829_v60, %v2558_v26  ;;  %v550_v50 = vsel %vm69_vm0, %v395_v58, 0.0  ;;  %v553_v51 = vsel %vm69_vm0, %v396_v59, 0.0 }
  0xfc   :  { %548 = vadd.xlane.f32.xlu0 %v547_v18  ;;  %551 = vadd.xlane.f32.xlu1 %v550_v50  ;;  %v234_v10 = vpop.xlane.xlu0 %233 }
  0xfd   :  { %v2565_v43 = vmul.f32 0.020408163, %v234_v10  ;;  %v397_v27 = vmul.f32 %v342_v22, %v342_v22  ;;  %v398_v35 = vmul.f32 %v343_v3, %v343_v3 }
  0xff   :  { %3830 = vst [vmem:[#allocation3_spill] sm:$0xff] %v2565_v43  ;;  %v344_v7 = vsub.f32 %v3831_v6, %v2565_v43  ;;  %v556_v42 = vsel %vm69_vm0, %v397_v27, 0.0  ;;  %v559_v60 = vsel %vm69_vm0, %v398_v35, 0.0 }
 0x100   :  { %554 = vadd.xlane.f32.xlu0 %v553_v51  ;;  %557 = vadd.xlane.f32.xlu1 %v556_v42 }
 0x101   :  { %v399_v34 = vmul.f32 %v344_v7, %v344_v7 }
 0x103   :  { %v562_v18 = vsel %vm69_vm0, %v399_v34, 0.0 }
 0x104   :  { %560 = vadd.xlane.f32.xlu0 %v559_v60  ;;  %563 = vadd.xlane.f32.xlu1 %v562_v18  ;;  %v730_v18 = vld [vmem:[%s3729_s1] sm:$0xff] }
 0x125   :  { %v402_v58 = vpop.xlane.xlu1 %401 }
 0x126   :  { %v565_v50 = vmul.f32 0.020408163, %v402_v58 }
 0x128   :  { %v620_v10 = vadd.f32 1e-05, %v565_v50 }
 0x129   :  { %v408_v59 = vpop.xlane.xlu1 %407  ;;  %v405_v22 = vpop.xlane.xlu0 %404 }
 0x12a   :  { %1727 = vrsqrt.f32 %v620_v10  ;;  %v567_v3 = vmul.f32 0.020408163, %v408_v59  ;;  %v566_v26 = vmul.f32 0.020408163, %v405_v22 }
 0x12c   :  { %v621_v6 = vadd.f32 1e-05, %v566_v26  ;;  %v622_v43 = vadd.f32 1e-05, %v567_v3 }
 0x12d   :  { %v414_v27 = vpop.xlane.xlu1 %413  ;;  %v411_v51 = vpop.xlane.xlu0 %410 }
 0x12e   :  { %v568_v42 = vmul.f32 0.020408163, %v411_v51  ;;  %1729 = vrsqrt.f32 %v621_v6  ;;  %v569_v35 = vmul.f32 0.020408163, %v414_v27 }
 0x12f   :  { %1731 = vrsqrt.f32 %v622_v43  ;;  %v731_v43 = vld [vmem:[%s3729_s1 + $0x8] sm:$0xff] }
 0x130   :  { %v623_v7 = vadd.f32 1e-05, %v568_v42  ;;  %v624_v50 = vadd.f32 1e-05, %v569_v35 }
 0x131   :  { %v420_v34 = vpop.xlane.xlu1 %419  ;;  %v417_v60 = vpop.xlane.xlu0 %416 }
 0x132   :  { %1733 = vrsqrt.f32 %v623_v7  ;;  %v570_v10 = vmul.f32 0.020408163, %v417_v60  ;;  %v571_v6 = vmul.f32 0.020408163, %v420_v34  ;;  %v732_v60 = vld [vmem:[%s3729_s1 + $0x10] sm:$0xff] }
 0x133   :  { %1735 = vrsqrt.f32 %v624_v50 }
 0x134   :  { %v1728_v58 = vpop.eup %1727  ;;  %v625_v27 = vadd.f32 1e-05, %v570_v10 }
 0x135   :  { %v426_v59 = vpop.xlane.xlu1 %425  ;;  %v423_v26 = vpop.xlane.xlu0 %422  ;;  %v2576_v22 = vmul.f32 %v1728_v58, %v730_v18  ;;  %v626_v58 = vadd.f32 1e-05, %v571_v6 }
 0x136   :  { %1737 = vrsqrt.f32 %v625_v27  ;;  %v572_v11 = vmul.f32 0.020408163, %v423_v26 }
 0x137   :  { %1007 = vperm.xlu0 %1725, %v2576_v22  }
 0x138   :  { %v1730_v3 = vpop.eup %1729 }
 0x139   :  { %v432_v51 = vpop.xlane.xlu1 %431  ;;  %v429_v42 = vpop.xlane.xlu0 %428  ;;  %v2582_v35 = vmul.f32 %v1730_v3, %v731_v43  ;;  %v733_v43 = vld [vmem:[%s3729_s1 + $0x18] sm:$0xff] }
 0x13a   :  { %v574_v19 = vmul.f32 0.020408163, %v429_v42  ;;  %v1732_v7 = vpop.eup %1731  ;;  %v627_v42 = vadd.f32 1e-05, %v572_v11 }
 0x13b   :  { %1012 = vperm.xlu1 %1726, %v2582_v35   ;;  %v2588_v10 = vmul.f32 %v1732_v7, %v732_v60  ;;  %v734_v7 = vld [vmem:[%s3729_s1 + $0x20] sm:$0xff] }
 0x13c   :  { %v629_v18 = vadd.f32 1e-05, %v574_v19  ;;  %v1734_v4 = vpop.eup %1733  ;;  %v573_v19 = vmul.f32 0.020408163, %v426_v59 }
 0x13d   :  { %v438_v56 = vpop.xlane.xlu1 %437  ;;  %v435_v50 = vpop.xlane.xlu0 %434  ;;  %v2594_v52 = vmul.f32 %v1734_v4, %v733_v43  ;;  %v735_v4 = vld [vmem:[%s3729_s1 + $0x28] sm:$0xff] }
 0x13e   :  { %v576_v34 = vmul.f32 0.020408163, %v435_v50  ;;  %1739 = vrsqrt.f32 %v629_v18  ;;  %v1736_v50 = vpop.eup %1735  ;;  %v628_v18 = vadd.f32 1e-05, %v573_v19  ;;  %v739_v43 = vld [vmem:[%s3729_s1 + $0x48] sm:$0xff] }
 0x13f   :  { %1017 = vperm.xlu1 %1726, %v2588_v10   ;;  %1741 = vrsqrt.f32 %v626_v58  ;;  %v2600_v61 = vmul.f32 %v1736_v50, %v734_v7 }
 0x140   :  { %v631_v3 = vadd.f32 1e-05, %v576_v34  ;;  %v575_v34 = vmul.f32 0.020408163, %v432_v51 }
 0x141   :  { %v444_v6 = vpop.xlane.xlu1 %443  ;;  %v441_v27 = vpop.xlane.xlu0 %440 }
 0x142   :  { %v578_v26 = vmul.f32 0.020408163, %v441_v27  ;;  %1743 = vrsqrt.f32 %v631_v3  ;;  %v1738_v27 = vpop.eup %1737  ;;  %v630_v51 = vadd.f32 1e-05, %v575_v34 }
 0x143   :  { %1022 = vperm.xlu1 %1726, %v2594_v52   ;;  %1745 = vrsqrt.f32 %v627_v42  ;;  %v577_v42 = vmul.f32 0.020408163, %v438_v56 }
 0x144   :  { %v633_v60 = vadd.f32 1e-05, %v578_v26 }
 0x145   :  { %v450_v58 = vpop.xlane.xlu1 %449  ;;  %v447_v59 = vpop.xlane.xlu0 %446  ;;  %v632_v34 = vadd.f32 1e-05, %v577_v42 }
 0x146   :  { %v580_v11 = vmul.f32 0.020408163, %v447_v59  ;;  %1747 = vrsqrt.f32 %v633_v60  ;;  %v2609_v59 = vmul.f32 %v1738_v27, %v735_v4  ;;  %v579_v27 = vmul.f32 0.020408163, %v444_v6 }
 0x147   :  { %1027 = vperm.xlu1 %1726, %v2600_v61   ;;  %1749 = vrsqrt.f32 %v628_v18 }
 0x148   :  { %v635_v3 = vadd.f32 1e-05, %v580_v11  ;;  %v1740_v19 = vpop.eup %1739  ;;  %v741_v11 = vld [vmem:[%s3729_s1 + $0x58] sm:$0xff] }
 0x149   :  { %v456_v26 = vpop.xlane.xlu1 %455  ;;  %v453_v50 = vpop.xlane.xlu0 %452  ;;  %v2611_v60 = vmul.f32 %v1740_v19, %v739_v43 }
 0x14a   :  { %v582_v7 = vmul.f32 0.020408163, %v453_v50  ;;  %v1742_v48 = vpop.eup %1741  ;;  %1751 = vrsqrt.f32 %v635_v3 }
 0x14b   :  { %1032 = vperm.xlu1 %1726, %v2609_v59   ;;  %1052 = vperm.xlu0 %1725, %v2611_v60   ;;  %1753 = vrsqrt.f32 %v630_v51  ;;  %v2621_v19 = vmul.f32 %v1742_v48, %v736_v57  ;;  %v634_v48 = vadd.f32 1e-05, %v579_v27  ;;  %v581_v57 = vmul.f32 0.020408163, %v450_v58 }
 0x14c   :  { %v637_v18 = vadd.f32 1e-05, %v582_v7  ;;  %v1744_v56 = vpop.eup %1743  ;;  %v737_v7 = vld [vmem:[%s3729_s1 + $0x38] sm:$0xff] }
 0x14d   :  { %v462_v4 = vpop.xlane.xlu1 %461  ;;  %v459_v43 = vpop.xlane.xlu0 %458  ;;  %v2623_v50 = vmul.f32 %v1744_v56, %v741_v11 }
 0x14e   :  { %v584_v3 = vmul.f32 0.020408163, %v459_v43  ;;  %v1746_v44 = vpop.eup %1745  ;;  %1755 = vrsqrt.f32 %v637_v18 }
 0x14f   :  { %1037 = vperm.xlu1 %1726, %v2621_v19   ;;  %1062 = vperm.xlu0 %1725, %v2623_v50   ;;  %1757 = vrsqrt.f32 %v632_v34  ;;  %v2633_v56 = vmul.f32 %v1746_v44, %v737_v7  ;;  %v636_v44 = vadd.f32 1e-05, %v581_v57 }
 0x150   :  { %v639_v51 = vadd.f32 1e-05, %v584_v3  ;;  %v1748_v6 = vpop.eup %1747  ;;  %v738_v3 = vld [vmem:[%s3729_s1 + $0x40] sm:$0xff] }
 0x151   :  { %v468_v42 = vpop.xlane.xlu1 %467  ;;  %v465_v11 = vpop.xlane.xlu0 %464  ;;  %v2635_v43 = vmul.f32 %v1748_v6, %v743_v53  ;;  %v583_v53 = vmul.f32 0.020408163, %v456_v26 }
 0x152   :  { %v586_v18 = vmul.f32 0.020408163, %v465_v11  ;;  %v1750_v40 = vpop.eup %1749  ;;  %1759 = vrsqrt.f32 %v639_v51 }
 0x153   :  { %1042 = vperm.xlu1 %1726, %v2633_v56   ;;  %1072 = vperm.xlu0 %1725, %v2635_v43   ;;  %1761 = vrsqrt.f32 %v634_v48  ;;  %v2645_v6 = vmul.f32 %v1750_v40, %v738_v3  ;;  %v638_v40 = vadd.f32 1e-05, %v583_v53 }
 0x154   :  { %v641_v34 = vadd.f32 1e-05, %v586_v18  ;;  %v1752_v58 = vpop.eup %1751  ;;  %v740_v18 = vld [vmem:[%s3729_s1 + $0x50] sm:$0xff] }
 0x155   :  { %v474_v27 = vpop.xlane.xlu1 %473  ;;  %v471_v7 = vpop.xlane.xlu0 %470  ;;  %v2647_v11 = vmul.f32 %v1752_v58, %v745_v49  ;;  %v585_v49 = vmul.f32 0.020408163, %v462_v4 }
 0x156   :  { %v588_v51 = vmul.f32 0.020408163, %v471_v7  ;;  %v1754_v37 = vpop.eup %1753  ;;  %1763 = vrsqrt.f32 %v641_v34 }
 0x157   :  { %1047 = vperm.xlu1 %1726, %v2645_v6   ;;  %1082 = vperm.xlu0 %1725, %v2647_v11   ;;  %1765 = vrsqrt.f32 %v636_v44  ;;  %v2657_v58 = vmul.f32 %v1754_v37, %v740_v18  ;;  %v640_v37 = vadd.f32 1e-05, %v585_v49 }
 0x158   :  { %v643_v48 = vadd.f32 1e-05, %v588_v51  ;;  %v1756_v26 = vpop.eup %1755  ;;  %v742_v51 = vld [vmem:[%s3729_s1 + $0x60] sm:$0xff] }
 0x159   :  { %v480_v57 = vpop.xlane.xlu1 %479  ;;  %v477_v3 = vpop.xlane.xlu0 %476  ;;  %v2659_v7 = vmul.f32 %v1756_v26, %v747_v45  ;;  %v587_v45 = vmul.f32 0.020408163, %v468_v42 }
 0x15a   :  { %v590_v34 = vmul.f32 0.020408163, %v477_v3  ;;  %v1758_v32 = vpop.eup %1757  ;;  %1767 = vrsqrt.f32 %v643_v48 }
 0x15b   :  { %1057 = vperm.xlu1 %1726, %v2657_v58   ;;  %1092 = vperm.xlu0 %1725, %v2659_v7   ;;  %1769 = vrsqrt.f32 %v638_v40  ;;  %v2669_v26 = vmul.f32 %v1758_v32, %v742_v51  ;;  %v642_v32 = vadd.f32 1e-05, %v587_v45 }
 0x15c   :  { %v645_v44 = vadd.f32 1e-05, %v590_v34  ;;  %v1760_v4 = vpop.eup %1759  ;;  %v744_v34 = vld [vmem:[%s3729_s1 + $0x70] sm:$0xff] }
 0x15d   :  { %v486_v53 = vpop.xlane.xlu1 %485  ;;  %v483_v18 = vpop.xlane.xlu0 %482  ;;  %v2671_v3 = vmul.f32 %v1760_v4, %v749_v41  ;;  %v589_v41 = vmul.f32 0.020408163, %v474_v27 }
 0x15e   :  { %v592_v48 = vmul.f32 0.020408163, %v483_v18  ;;  %v1762_v29 = vpop.eup %1761  ;;  %1771 = vrsqrt.f32 %v645_v44 }
 0x15f   :  { %3832 = vst [vmem:[#allocation4_spill] sm:$0xff] %v2671_v3  ;;  %1067 = vperm.xlu1 %1726, %v2669_v26   ;;  %1102 = vperm.xlu0 %1725, %v2671_v3   ;;  %1773 = vrsqrt.f32 %v640_v37  ;;  %v2681_v4 = vmul.f32 %v1762_v29, %v744_v34  ;;  %v644_v29 = vadd.f32 1e-05, %v589_v41 }
 0x160   :  { %v647_v40 = vadd.f32 1e-05, %v592_v48  ;;  %v1764_v42 = vpop.eup %1763  ;;  %v746_v48 = vld [vmem:[%s3729_s1 + $0x80] sm:$0xff] }
 0x161   :  { %v492_v49 = vpop.xlane.xlu1 %491  ;;  %v489_v51 = vpop.xlane.xlu0 %488  ;;  %v2683_v18 = vmul.f32 %v1764_v42, %v751_v13  ;;  %v591_v13 = vmul.f32 0.020408163, %v480_v57 }
 0x162   :  { %v594_v44 = vmul.f32 0.020408163, %v489_v51  ;;  %v1766_v36 = vpop.eup %1765  ;;  %1775 = vrsqrt.f32 %v647_v40 }
 0x163   :  { %3833 = vst [vmem:[#allocation5_spill] sm:$0xff] %v2683_v18  ;;  %1077 = vperm.xlu1 %1726, %v2681_v4   ;;  %1112 = vperm.xlu0 %1725, %v2683_v18   ;;  %1777 = vrsqrt.f32 %v642_v32  ;;  %v2693_v42 = vmul.f32 %v1766_v36, %v746_v48  ;;  %v646_v36 = vadd.f32 1e-05, %v591_v13 }
 0x164   :  { %v649_v37 = vadd.f32 1e-05, %v594_v44  ;;  %v1768_v27 = vpop.eup %1767  ;;  %v748_v44 = vld [vmem:[%s3729_s1 + $0x90] sm:$0xff] }
 0x165   :  { %v498_v45 = vpop.xlane.xlu1 %497  ;;  %v495_v34 = vpop.xlane.xlu0 %494  ;;  %v2695_v51 = vmul.f32 %v1768_v27, %v753_v33  ;;  %v593_v33 = vmul.f32 0.020408163, %v486_v53 }
 0x166   :  { %v596_v40 = vmul.f32 0.020408163, %v495_v34  ;;  %v1770_v20 = vpop.eup %1769  ;;  %1779 = vrsqrt.f32 %v649_v37 }
 0x167   :  { %3834 = vst [vmem:[#allocation38_spill] sm:$0xff] %v2695_v51  ;;  %1087 = vperm.xlu1 %1726, %v2693_v42   ;;  %1122 = vperm.xlu0 %1725, %v2695_v51   ;;  %1781 = vrsqrt.f32 %v644_v29  ;;  %v2705_v27 = vmul.f32 %v1770_v20, %v748_v44  ;;  %v757_v51 = vld [vmem:[%s3729_s1 + $0xd8] sm:$0xff]  ;;  %v648_v20 = vadd.f32 1e-05, %v593_v33 }
 0x168   :  { %v651_v32 = vadd.f32 1e-05, %v596_v40  ;;  %v1772_v57 = vpop.eup %1771  ;;  %v750_v40 = vld [vmem:[%s3729_s1 + $0xa0] sm:$0xff] }
 0x169   :  { %v504_v41 = vpop.xlane.xlu1 %503  ;;  %v501_v48 = vpop.xlane.xlu0 %500  ;;  %v2707_v34 = vmul.f32 %v1772_v57, %v755_v24  ;;  %v595_v24 = vmul.f32 0.020408163, %v492_v49 }
 0x16a   :  { %v598_v37 = vmul.f32 0.020408163, %v501_v48  ;;  %v1774_v16 = vpop.eup %1773  ;;  %1783 = vrsqrt.f32 %v651_v32 }
 0x16b   :  { %3835 = vst [vmem:[#allocation39_spill] sm:$0xff] %v2707_v34  ;;  %1097 = vperm.xlu1 %1726, %v2705_v27   ;;  %1132 = vperm.xlu0 %1725, %v2707_v34   ;;  %1785 = vrsqrt.f32 %v646_v36  ;;  %v2717_v57 = vmul.f32 %v1774_v16, %v750_v40  ;;  %v759_v34 = vld [vmem:[%s3729_s1 + $0xe8] sm:$0xff]  ;;  %v650_v16 = vadd.f32 1e-05, %v595_v24 }
 0x16c   :  { %v653_v29 = vadd.f32 1e-05, %v598_v37  ;;  %v1776_v53 = vpop.eup %1775  ;;  %v752_v37 = vld [vmem:[%s3729_s1 + $0xb0] sm:$0xff] }
 0x16d   :  { %v510_v13 = vpop.xlane.xlu1 %509  ;;  %v507_v44 = vpop.xlane.xlu0 %506  ;;  %v2719_v48 = vmul.f32 %v1776_v53, %v757_v51  ;;  %v597_v51 = vmul.f32 0.020408163, %v498_v45 }
 0x16e   :  { %v600_v32 = vmul.f32 0.020408163, %v507_v44  ;;  %v1778_v25 = vpop.eup %1777  ;;  %1787 = vrsqrt.f32 %v653_v29 }
 0x16f   :  { %3836 = vst [vmem:[#allocation40_spill] sm:$0xff] %v2719_v48  ;;  %1107 = vperm.xlu1 %1726, %v2717_v57   ;;  %1142 = vperm.xlu0 %1725, %v2719_v48   ;;  %1789 = vrsqrt.f32 %v648_v20  ;;  %v2729_v53 = vmul.f32 %v1778_v25, %v752_v37  ;;  %v761_v48 = vld [vmem:[%s3729_s1 + $0xf8] sm:$0xff]  ;;  %v652_v25 = vadd.f32 1e-05, %v597_v51 }
 0x170   :  { %v655_v36 = vadd.f32 1e-05, %v600_v32  ;;  %v1780_v49 = vpop.eup %1779  ;;  %v754_v32 = vld [vmem:[%s3729_s1 + $0xc0] sm:$0xff] }
 0x171   :  { %v516_v33 = vpop.xlane.xlu1 %515  ;;  %v513_v40 = vpop.xlane.xlu0 %512  ;;  %v2731_v44 = vmul.f32 %v1780_v49, %v759_v34  ;;  %v599_v34 = vmul.f32 0.020408163, %v504_v41 }
 0x172   :  { %v602_v29 = vmul.f32 0.020408163, %v513_v40  ;;  %v1782_v18 = vpop.eup %1781  ;;  %1791 = vrsqrt.f32 %v655_v36 }
 0x173   :  { %3837 = vst [vmem:[#allocation41_spill] sm:$0xff] %v2731_v44  ;;  %1117 = vperm.xlu1 %1726, %v2729_v53   ;;  %1152 = vperm.xlu0 %1725, %v2731_v44   ;;  %1793 = vrsqrt.f32 %v650_v16  ;;  %v2741_v49 = vmul.f32 %v1782_v18, %v754_v32  ;;  %v763_v44 = vld [vmem:[%s3729_s1 + $0x108] sm:$0xff]  ;;  %v654_v18 = vadd.f32 1e-05, %v599_v34 }
 0x174   :  { %v657_v20 = vadd.f32 1e-05, %v602_v29  ;;  %v1784_v45 = vpop.eup %1783  ;;  %v756_v29 = vld [vmem:[%s3729_s1 + $0xd0] sm:$0xff] }
 0x175   :  { %v522_v24 = vpop.xlane.xlu1 %521  ;;  %v519_v37 = vpop.xlane.xlu0 %518  ;;  %v2743_v40 = vmul.f32 %v1784_v45, %v761_v48  ;;  %v601_v48 = vmul.f32 0.020408163, %v510_v13 }
 0x176   :  { %v604_v36 = vmul.f32 0.020408163, %v519_v37  ;;  %v1786_v28 = vpop.eup %1785  ;;  %1795 = vrsqrt.f32 %v657_v20 }
 0x177   :  { %3838 = vst [vmem:[#allocation42_spill] sm:$0xff] %v2743_v40  ;;  %1127 = vperm.xlu1 %1726, %v2741_v49   ;;  %1162 = vperm.xlu0 %1725, %v2743_v40   ;;  %1797 = vrsqrt.f32 %v652_v25  ;;  %v2753_v45 = vmul.f32 %v1786_v28, %v756_v29  ;;  %v765_v40 = vld [vmem:[%s3729_s1 + $0x118] sm:$0xff]  ;;  %v656_v28 = vadd.f32 1e-05, %v601_v48 }
 0x178   :  { %v659_v16 = vadd.f32 1e-05, %v604_v36  ;;  %v1788_v41 = vpop.eup %1787  ;;  %v758_v36 = vld [vmem:[%s3729_s1 + $0xe0] sm:$0xff] }
 0x179   :  { %v528_v51 = vpop.xlane.xlu1 %527  ;;  %v525_v32 = vpop.xlane.xlu0 %524  ;;  %3839 = vst [vmem:[#allocation43_spill] sm:$0xff] %v2753_v45  ;;  %v2755_v37 = vmul.f32 %v1788_v41, %v763_v44  ;;  %v603_v44 = vmul.f32 0.020408163, %v516_v33 }
 0x17a   :  { %v606_v20 = vmul.f32 0.020408163, %v525_v32  ;;  %v1790_v9 = vpop.eup %1789  ;;  %1799 = vrsqrt.f32 %v659_v16 }
 0x17b   :  { %3840 = vst [vmem:[#allocation44_spill] sm:$0xff] %v2755_v37  ;;  %1137 = vperm.xlu1 %1726, %v2753_v45   ;;  %1172 = vperm.xlu0 %1725, %v2755_v37   ;;  %1801 = vrsqrt.f32 %v654_v18  ;;  %v2765_v41 = vmul.f32 %v1790_v9, %v758_v36  ;;  %v767_v37 = vld [vmem:[%s3729_s1 + $0x128] sm:$0xff]  ;;  %v658_v9 = vadd.f32 1e-05, %v603_v44 }
 0x17c   :  { %v661_v25 = vadd.f32 1e-05, %v606_v20  ;;  %v1792_v13 = vpop.eup %1791  ;;  %v760_v20 = vld [vmem:[%s3729_s1 + $0xf0] sm:$0xff] }
 0x17d   :  { %v534_v34 = vpop.xlane.xlu1 %533  ;;  %v531_v29 = vpop.xlane.xlu0 %530  ;;  %v2767_v32 = vmul.f32 %v1792_v13, %v765_v40  ;;  %v605_v40 = vmul.f32 0.020408163, %v522_v24 }
 0x17e   :  { %v608_v16 = vmul.f32 0.020408163, %v531_v29  ;;  %v1794_v3 = vpop.eup %1793  ;;  %1803 = vrsqrt.f32 %v661_v25 }
 0x17f   :  { %3841 = vst [vmem:[#allocation45_spill] sm:$0xff] %v2767_v32  ;;  %1147 = vperm.xlu1 %1726, %v2765_v41   ;;  %1182 = vperm.xlu0 %1725, %v2767_v32   ;;  %1805 = vrsqrt.f32 %v656_v28  ;;  %v2777_v13 = vmul.f32 %v1794_v3, %v760_v20  ;;  %v769_v32 = vld [vmem:[%s3729_s1 + $0x138] sm:$0xff]  ;;  %v660_v3 = vadd.f32 1e-05, %v605_v40 }
 0x180   :  { %v663_v18 = vadd.f32 1e-05, %v608_v16  ;;  %v1796_v33 = vpop.eup %1795  ;;  %v762_v16 = vld [vmem:[%s3729_s1 + $0x100] sm:$0xff] }
 0x181   :  { %v537_v48 = vpop.xlane.xlu0 %536  ;;  %v540_v36 = vpop.xlane.xlu1 %539  ;;  %3842 = vst [vmem:[#allocation46_spill] sm:$0xff] %v2777_v13  ;;  %v2779_v29 = vmul.f32 %v1796_v33, %v767_v37  ;;  %v607_v37 = vmul.f32 0.020408163, %v528_v51 }
 0x182   :  { %v610_v25 = vmul.f32 0.020408163, %v537_v48  ;;  %v1798_v45 = vpop.eup %1797  ;;  %1807 = vrsqrt.f32 %v663_v18 }
 0x183   :  { %3843 = vst [vmem:[#allocation47_spill] sm:$0xff] %v2779_v29  ;;  %1157 = vperm.xlu1 %1726, %v2777_v13   ;;  %1192 = vperm.xlu0 %1725, %v2779_v29   ;;  %1809 = vrsqrt.f32 %v658_v9  ;;  %v2789_v18 = vmul.f32 %v1798_v45, %v762_v16  ;;  %v771_v29 = vld [vmem:[%s3729_s1 + $0x148] sm:$0xff]  ;;  %v662_v45 = vadd.f32 1e-05, %v607_v37 }
 0x184   :  { %v665_v28 = vadd.f32 1e-05, %v610_v25  ;;  %v1800_v24 = vpop.eup %1799  ;;  %v764_v25 = vld [vmem:[%s3729_s1 + $0x110] sm:$0xff] }
 0x185   :  { %v543_v44 = vpop.xlane.xlu0 %542  ;;  %3844 = vst [vmem:[#allocation48_spill] sm:$0xff] %v2789_v18  ;;  %v2791_v33 = vmul.f32 %v1800_v24, %v769_v32  ;;  %v1802_v48 = vpop.eup %1801  ;;  %v609_v32 = vmul.f32 0.020408163, %v534_v34 }
 0x186   :  { %v612_v20 = vmul.f32 0.020408163, %v543_v44  ;;  %1811 = vrsqrt.f32 %v665_v28  ;;  %v546_v13 = vpop.xlane.xlu1 %545  ;;  %v2801_v28 = vmul.f32 %v1802_v48, %v764_v25 }
 0x187   :  { %3845 = vst [vmem:[#allocation49_spill] sm:$0xff] %v2791_v33  ;;  %1167 = vperm.xlu1 %1726, %v2789_v18   ;;  %1202 = vperm.xlu0 %1725, %v2791_v33   ;;  %1813 = vrsqrt.f32 %v660_v3  ;;  %v773_v33 = vld [vmem:[%s3729_s1 + $0x158] sm:$0xff]  ;;  %v664_v3 = vadd.f32 1e-05, %v609_v32 }
 0x188   :  { %v667_v9 = vadd.f32 1e-05, %v612_v20  ;;  %v1804_v51 = vpop.eup %1803  ;;  %v766_v20 = vld [vmem:[%s3729_s1 + $0x120] sm:$0xff] }
 0x189   :  { %v549_v40 = vpop.xlane.xlu0 %548  ;;  %v2803_v24 = vmul.f32 %v1804_v51, %v771_v29  ;;  %v1806_v44 = vpop.eup %1805  ;;  %v611_v29 = vmul.f32 0.020408163, %v540_v36 }
 0x18a   :  { %v614_v16 = vmul.f32 0.020408163, %v549_v40  ;;  %1815 = vrsqrt.f32 %v667_v9  ;;  %v552_v48 = vpop.xlane.xlu1 %551  ;;  %v2813_v9 = vmul.f32 %v1806_v44, %v766_v20 }
 0x18b   :  { %3846 = vst [vmem:[#allocation50_spill] sm:$0xff] %v2803_v24  ;;  %1177 = vperm.xlu1 %1726, %v2801_v28   ;;  %1212 = vperm.xlu0 %1725, %v2803_v24   ;;  %1817 = vrsqrt.f32 %v662_v45  ;;  %v775_v24 = vld [vmem:[%s3729_s1 + $0x168] sm:$0xff]  ;;  %v666_v32 = vadd.f32 1e-05, %v611_v29  ;;  %v615_v29 = vmul.f32 0.020408163, %v552_v48 }
 0x18c   :  { %v669_v18 = vadd.f32 1e-05, %v614_v16  ;;  %v1808_v34 = vpop.eup %1807  ;;  %3847 = vst [vmem:[#allocation51_spill] sm:$0xff] %v2813_v9  ;;  %v768_v16 = vld [vmem:[%s3729_s1 + $0x130] sm:$0xff] }
 0x18d   :  { %v555_v37 = vpop.xlane.xlu0 %554  ;;  %v2815_v51 = vmul.f32 %v1808_v34, %v773_v33  ;;  %v1810_v40 = vpop.eup %1809  ;;  %v613_v33 = vmul.f32 0.020408163, %v546_v13  ;;  %v670_v48 = vadd.f32 1e-05, %v615_v29 }
 0x18e   :  { %v616_v25 = vmul.f32 0.020408163, %v555_v37  ;;  %1819 = vrsqrt.f32 %v669_v18  ;;  %v2825_v18 = vmul.f32 %v1810_v40, %v768_v16 }
 0x18f   :  { %3848 = vst [vmem:[#allocation52_spill] sm:$0xff] %v2815_v51  ;;  %1187 = vperm.xlu1 %1726, %v2813_v9   ;;  %1222 = vperm.xlu0 %1725, %v2815_v51   ;;  %1821 = vrsqrt.f32 %v664_v3  ;;  %v777_v51 = vld [vmem:[%s3729_s1 + $0x178] sm:$0xff]  ;;  %v558_v9 = vpop.xlane.xlu1 %557 }
 0x190   :  { %v671_v45 = vadd.f32 1e-05, %v616_v25  ;;  %v1812_v36 = vpop.eup %1811  ;;  %v770_v25 = vld [vmem:[%s3729_s1 + $0x140] sm:$0xff] }
 0x191   :  { %v561_v44 = vpop.xlane.xlu0 %560  ;;  %v2827_v34 = vmul.f32 %v1812_v36, %v775_v24  ;;  %v1814_v37 = vpop.eup %1813  ;;  %v668_v24 = vadd.f32 1e-05, %v613_v33  ;;  %v772_v36 = vld [vmem:[%s3729_s1 + $0x150] sm:$0xff]  ;;  %v617_v33 = vmul.f32 0.020408163, %v558_v9 }
 0x192   :  { %v618_v20 = vmul.f32 0.020408163, %v561_v44  ;;  %1823 = vrsqrt.f32 %v671_v45  ;;  %v2837_v40 = vmul.f32 %v1814_v37, %v770_v25  ;;  %v779_v44 = vld [vmem:[%s3729_s1 + $0x188] sm:$0xff] }
 0x193   :  { %3849 = vst [vmem:[#allocation53_spill] sm:$0xff] %v2827_v34  ;;  %1197 = vperm.xlu1 %1726, %v2825_v18   ;;  %1232 = vperm.xlu0 %1725, %v2827_v34   ;;  %1825 = vrsqrt.f32 %v666_v32  ;;  %v672_v9 = vadd.f32 1e-05, %v617_v33  ;;  %v840_v34 = vld [vmem:[%s3730_s2] sm:$0xff] }
 0x194   :  { %v673_v3 = vadd.f32 1e-05, %v618_v20  ;;  %v1816_v13 = vpop.eup %1815 }
 0x195   :  { %v2839_v16 = vmul.f32 %v1816_v13, %v777_v51  ;;  %v1818_v45 = vpop.eup %1817  ;;  %v564_v51 = vpop.xlane.xlu1 %563  ;;  %v781_v13 = vld [vmem:[%s3729_s1 + $0x198] sm:$0xff] }
 0x196   :  { %1827 = vrsqrt.f32 %v673_v3  ;;  %v2849_v20 = vmul.f32 %v1818_v45, %v772_v36  ;;  %v774_v3 = vld [vmem:[%s3729_s1 + $0x160] sm:$0xff]  ;;  %v619_v29 = vmul.f32 0.020408163, %v564_v51 }
 0x197   :  { %3850 = vst [vmem:[#allocation54_spill] sm:$0xff] %v2839_v16  ;;  %1207 = vperm.xlu1 %1726, %v2837_v40   ;;  %1242 = vperm.xlu0 %1725, %v2839_v16   ;;  %1829 = vrsqrt.f32 %v668_v24  ;;  %v783_v16 = vld [vmem:[%s3729_s1 + $0x1a8] sm:$0xff] }
 0x198   :  { %v1820_v32 = vpop.eup %1819  ;;  %1831 = vrsqrt.f32 %v670_v48  ;;  %v674_v33 = vadd.f32 1e-05, %v619_v29  ;;  %v3853_v29 = vld [vmem:[#allocation7_spill] sm:$0xff] }
 0x199   :  { %v2851_v37 = vmul.f32 %v1820_v32, %v779_v44  ;;  %v1822_v25 = vpop.eup %1821  ;;  %v776_v32 = vld [vmem:[%s3729_s1 + $0x170] sm:$0xff]  ;;  %1833 = vrsqrt.f32 %v672_v9 }
 0x19a   :  { %v2861_v45 = vmul.f32 %v1822_v25, %v774_v3  ;;  %v3852_v3 = vld [vmem:[#allocation6_spill] sm:$0xff]  ;;  %1835 = vrsqrt.f32 %v674_v33 }
 0x19b   :  { %3851 = vst [vmem:[#allocation55_spill] sm:$0xff] %v2851_v37  ;;  %1217 = vperm.xlu1 %1726, %v2849_v20   ;;  %1252 = vperm.xlu0 %1725, %v2851_v37   ;;  %v778_v37 = vld [vmem:[%s3729_s1 + $0x180] sm:$0xff] }
 0x19c   :  { %v1824_v24 = vpop.eup %1823 }
 0x19d   :  { %v2863_v36 = vmul.f32 %v1824_v24, %v781_v13  ;;  %v1826_v44 = vpop.eup %1825  ;;  %v895_v13 = vmul.f32 %v2576_v22, %v3852_v3  ;;  %v897_v22 = vmul.f32 %v2588_v10, %v3853_v29  ;;  %v782_v10 = vld [vmem:[%s3729_s1 + $0x1a0] sm:$0xff]  ;;  %v901_v29 = vmul.f32 %v2621_v19, %v2326_v0  ;;  %v841_v19 = vld [vmem:[%s3730_s2 + $0x8] sm:$0xff] }
 0x19e   :  { %v2873_v51 = vmul.f32 %v1826_v44, %v776_v32  ;;  %v780_v32 = vld [vmem:[%s3729_s1 + $0x190] sm:$0xff]  ;;  %v903_v0 = vmul.f32 %v2645_v6, %v2336_v5  ;;  %v843_v5 = vld [vmem:[%s3730_s2 + $0x18] sm:$0xff] }
 0x19f   :  { %1227 = vperm.xlu1 %1726, %v2861_v45   ;;  %1262 = vperm.xlu0 %1725, %v2863_v36  }
 0x1a0   :  { %v1828_v48 = vpop.eup %1827 }
 0x1a1   :  { %v2875_v25 = vmul.f32 %v1828_v48, %v783_v16  ;;  %v1830_v24 = vpop.eup %1829  ;;  %v950_v16 = vsub.f32 %v840_v34, %v895_v13  ;;  %v842_v48 = vld [vmem:[%s3730_s2 + $0x10] sm:$0xff]  ;;  %v899_v34 = vmul.f32 %v2600_v61, %v2316_v15  ;;  %v844_v13 = vld [vmem:[%s3730_s2 + $0x20] sm:$0xff] }
 0x1a2   :  { %v2887_v9 = vmul.f32 %v1830_v24, %v778_v37  ;;  %v1832_v44 = vpop.eup %1831  ;;  %v952_v37 = vsub.f32 %v842_v48, %v897_v22  ;;  %v784_v15 = vld [vmem:[%s3729_s1 + $0x1b0] sm:$0xff]  ;;  %v896_v48 = vmul.f32 %v2582_v35, %v2306_v46  ;;  %v905_v46 = vmul.f32 %v2657_v58, %v2346_v1  ;;  %v845_v1 = vld [vmem:[%s3730_s2 + $0x28] sm:$0xff]  ;;  %v852_v58 = vld [vmem:[%s3730_s2 + $0x60] sm:$0xff] }
 0x1a3   :  { %1237 = vperm.xlu1 %1726, %v2873_v51   ;;  %1272 = vperm.xlu0 %1725, %v2875_v25   ;;  %v2898_v3 = vmul.f32 %v1832_v44, %v780_v32  ;;  %v1834_v33 = vpop.eup %1833  ;;  %v846_v61 = vld [vmem:[%s3730_s2 + $0x30] sm:$0xff] }
 0x1a4   :  { %v2909_v24 = vmul.f32 %v1834_v33, %v782_v10  ;;  %v1836_v22 = vpop.eup %1835  ;;  %v956_v32 = vsub.f32 %v846_v61, %v901_v29  ;;  %v898_v10 = vmul.f32 %v2594_v52, %v2308_v47  ;;  %v850_v35 = vld [vmem:[%s3730_s2 + $0x50] sm:$0xff]  ;;  %v907_v47 = vmul.f32 %v2669_v26, %v2356_v55  ;;  %v847_v26 = vld [vmem:[%s3730_s2 + $0x38] sm:$0xff] }
 0x1a5   :  { %v2920_v44 = vmul.f32 %v1836_v22, %v784_v15  ;;  %v909_v55 = vmul.f32 %v2681_v4, %v2366_v30  ;;  %v854_v15 = vld [vmem:[%s3730_s2 + $0x70] sm:$0xff]  ;;  %v911_v30 = vmul.f32 %v2693_v42, %v2376_v63  ;;  %v849_v4 = vld [vmem:[%s3730_s2 + $0x48] sm:$0xff]  ;;  %v913_v63 = vmul.f32 %v2705_v27, %v2386_v2 }
 0x1a6   :  { %v953_v6 = vsub.f32 %v843_v5, %v898_v10  ;;  %v962_v22 = vsub.f32 %v852_v58, %v907_v47  ;;  %v915_v2 = vmul.f32 %v2717_v57, %v2396_v12  ;;  %v860_v5 = vld [vmem:[%s3730_s2 + $0xa0] sm:$0xff]  ;;  %v917_v12 = vmul.f32 %v2729_v53, %v2406_v21  ;;  %v857_v58 = vld [vmem:[%s3730_s2 + $0x88] sm:$0xff] }
 0x1a7   :  { %1247 = vperm.xlu1 %1726, %v2887_v9   ;;  %1337 = vperm.xlu0 %1725, %v950_v16   ;;  %v954_v16 = vsub.f32 %v844_v13, %v899_v34  ;;  %v951_v34 = vsub.f32 %v841_v19, %v896_v48  ;;  %v960_v13 = vsub.f32 %v850_v35, %v905_v46  ;;  %v856_v48 = vld [vmem:[%s3730_s2 + $0x80] sm:$0xff]  ;;  %v853_v46 = vld [vmem:[%s3730_s2 + $0x68] sm:$0xff] }
 0x1a8   :  { %v966_v19 = vsub.f32 %v856_v48, %v911_v30  ;;  %v919_v21 = vmul.f32 %v2741_v49, %v2416_v17  ;;  %v3855_v17 = vld [vmem:[#allocation11_spill] sm:$0xff] }
 0x1a9   :  { %v3856_v49 = vld [vmem:[#allocation43_spill] sm:$0xff] }
 0x1ab   :  { %1257 = vperm.xlu1 %1726, %v2898_v3   ;;  %1347 = vperm.xlu0 %1725, %v952_v37   ;;  %v848_v37 = vld [vmem:[%s3730_s2 + $0x40] sm:$0xff] }
 0x1ac   :  { %v958_v33 = vsub.f32 %v848_v37, %v903_v0  ;;  %v851_v37 = vld [vmem:[%s3730_s2 + $0x58] sm:$0xff] }
 0x1af   :  { %1267 = vperm.xlu1 %1726, %v2909_v24   ;;  %1357 = vperm.xlu0 %1725, %v954_v16   ;;  %v900_v16 = vmul.f32 %v2609_v59, %v2318_v39  ;;  %v902_v39 = vmul.f32 %v2633_v56, %v2328_v14  ;;  %v904_v14 = vmul.f32 %v2611_v60, %v2338_v23 }
 0x1b0   :  { %v906_v23 = vmul.f32 %v2623_v50, %v2348_v31  ;;  %v908_v31 = vmul.f32 %v2635_v43, %v2358_v38  ;;  %v910_v38 = vmul.f32 %v2647_v11, %v2368_v62  ;;  %v912_v62 = vmul.f32 %v2659_v7, %v2378_v54  ;;  %v3854_v54 = vld [vmem:[#allocation4_spill] sm:$0xff] }
 0x1b1   :  { %v955_v29 = vsub.f32 %v845_v1, %v900_v16  ;;  %v957_v61 = vsub.f32 %v847_v26, %v902_v39  ;;  %v959_v0 = vsub.f32 %v849_v4, %v904_v14  ;;  %v862_v16 = vld [vmem:[%s3730_s2 + $0xb0] sm:$0xff]  ;;  %v914_v7 = vmul.f32 %v3854_v54, %v2388_v8  ;;  %v3858_v4 = vld [vmem:[#allocation5_spill] sm:$0xff] }
 0x1b2   :  { %v963_v35 = vsub.f32 %v853_v46, %v908_v31  ;;  %v972_v1 = vsub.f32 %v862_v16, %v917_v12  ;;  %v3857_v8 = vld [vmem:[#allocation8_spill] sm:$0xff]  ;;  %v3860_v31 = vld [vmem:[#allocation9_spill] sm:$0xff] }
 0x1b3   :  { %1277 = vperm.xlu1 %1726, %v2920_v44   ;;  %1367 = vperm.xlu0 %1725, %v956_v32   ;;  %v964_v32 = vsub.f32 %v854_v15, %v909_v55  ;;  %v921_v55 = vmul.f32 %v3856_v49, %v3855_v17  ;;  %v916_v48 = vmul.f32 %v3858_v4, %v3857_v8  ;;  %v863_v12 = vld [vmem:[%s3730_s2 + $0xb8] sm:$0xff]  ;;  %v872_v17 = vld [vmem:[%s3730_s2 + $0x100] sm:$0xff] }
 0x1b6   :  { %v2983_v60 = vpop.permute.xlu0 %1007 }
 0x1b7   :  { %1342 = vperm.xlu1 %1726, %v951_v34   ;;  %1377 = vperm.xlu0 %1725, %v958_v33   ;;  %v858_v34 = vld [vmem:[%s3730_s2 + $0x90] sm:$0xff]  ;;  %v961_v33 = vsub.f32 %v851_v37, %v906_v23  ;;  %v861_v37 = vld [vmem:[%s3730_s2 + $0xa8] sm:$0xff] }
 0x1b8   :  { %v968_v10 = vsub.f32 %v858_v34, %v913_v63  ;;  %v868_v34 = vld [vmem:[%s3730_s2 + $0xe0] sm:$0xff] }
 0x1ba   :  { %v2947_v52 = vpop.permute.xlu1 %1012 }
 0x1bb   :  { %1352 = vperm.xlu1 %1726, %v953_v6   ;;  %1387 = vperm.xlu0 %1725, %v960_v13   ;;  %v970_v6 = vsub.f32 %v860_v5, %v915_v2  ;;  %v855_v13 = vld [vmem:[%s3730_s2 + $0x78] sm:$0xff]  ;;  %v3861_v2 = vld [vmem:[#allocation38_spill] sm:$0xff] }
 0x1bc   :  { %v965_v47 = vsub.f32 %v855_v13, %v910_v38  ;;  %v918_v46 = vmul.f32 %v3861_v2, %v3860_v31  ;;  %v3863_v5 = vld [vmem:[#allocation46_spill] sm:$0xff]  ;;  %v870_v13 = vld [vmem:[%s3730_s2 + $0xf0] sm:$0xff]  ;;  %v3874_v2 = vld [vmem:[#allocation51_spill] sm:$0xff] }
 0x1be   :  { %v2959_v59 = vpop.permute.xlu1 %1017  ;;  %v973_v16 = vsub.f32 %v863_v12, %v918_v46  ;;  %v876_v12 = vld [vmem:[%s3730_s2 + $0x120] sm:$0xff] }
 0x1bf   :  { %1362 = vperm.xlu1 %1726, %v955_v29   ;;  %1397 = vperm.xlu0 %1725, %v962_v22   ;;  %v864_v29 = vld [vmem:[%s3730_s2 + $0xc0] sm:$0xff]  ;;  %v967_v22 = vsub.f32 %v857_v58, %v912_v62  ;;  %v3865_v62 = vld [vmem:[#allocation39_spill] sm:$0xff]  ;;  %v3866_v58 = vld [vmem:[#allocation17_spill] sm:$0xff] }
 0x1c0   :  { %v974_v39 = vsub.f32 %v864_v29, %v919_v21  ;;  %v3867_v29 = vld [vmem:[#allocation48_spill] sm:$0xff] }
 0x1c2   :  { %v2971_v56 = vpop.permute.xlu1 %1022 }
 0x1c3   :  { %1372 = vperm.xlu1 %1726, %v957_v61   ;;  %1407 = vperm.xlu0 %1725, %v964_v32   ;;  %v859_v61 = vld [vmem:[%s3730_s2 + $0x98] sm:$0xff]  ;;  %v866_v32 = vld [vmem:[%s3730_s2 + $0xd0] sm:$0xff] }
 0x1c4   :  { %v969_v14 = vsub.f32 %v859_v61, %v914_v7  ;;  %v976_v30 = vsub.f32 %v866_v32, %v921_v55  ;;  %v865_v7 = vld [vmem:[%s3730_s2 + $0xc8] sm:$0xff]  ;;  %v3868_v61 = vld [vmem:[#allocation12_spill] sm:$0xff] }
 0x1c5   :  { %v3869_v32 = vld [vmem:[#allocation40_spill] sm:$0xff] }
 0x1c6   :  { %v2985_v42 = vpop.permute.xlu1 %1027 }
 0x1c7   :  { %1382 = vperm.xlu1 %1726, %v959_v0   ;;  %1417 = vperm.xlu0 %1725, %v966_v19   ;;  %v3859_v0 = vld [vmem:[#allocation13_spill] sm:$0xff] }
 0x1c8   :  { %v923_v19 = vmul.f32 %v2765_v41, %v3859_v0  ;;  %v3862_v41 = vld [vmem:[#allocation15_spill] sm:$0xff]  ;;  %v867_v0 = vld [vmem:[%s3730_s2 + $0xd8] sm:$0xff] }
 0x1ca   :  { %v2997_v50 = vpop.permute.xlu1 %1032  ;;  %v2999_v27 = vpop.permute.xlu0 %1052 }
 0x1cb   :  { %1392 = vperm.xlu1 %1726, %v961_v33   ;;  %1427 = vperm.xlu0 %1725, %v968_v10   ;;  %v971_v33 = vsub.f32 %v861_v37, %v916_v48  ;;  %v978_v10 = vsub.f32 %v868_v34, %v923_v19  ;;  %v874_v19 = vld [vmem:[%s3730_s2 + $0x110] sm:$0xff] }
 0x1ce   :  { %v3011_v43 = vpop.permute.xlu1 %1037  ;;  %v3013_v57 = vpop.permute.xlu0 %1062 }
 0x1cf   :  { %1402 = vperm.xlu1 %1726, %v963_v35   ;;  %1437 = vperm.xlu0 %1725, %v970_v6   ;;  %v925_v35 = vmul.f32 %v3863_v5, %v3862_v41 }
 0x1d2   :  { %v3025_v11 = vpop.permute.xlu1 %1042  ;;  %v3027_v53 = vpop.permute.xlu0 %1072 }
 0x1d3   :  { %1412 = vperm.xlu1 %1726, %v965_v47   ;;  %1447 = vperm.xlu0 %1725, %v972_v1   ;;  %v980_v47 = vsub.f32 %v870_v13, %v925_v35  ;;  %v3864_v1 = vld [vmem:[#allocation10_spill] sm:$0xff]  ;;  %v869_v35 = vld [vmem:[%s3730_s2 + $0xe8] sm:$0xff] }
 0x1d4   :  { %v920_v21 = vmul.f32 %v3865_v62, %v3864_v1  ;;  %v3876_v1 = vld [vmem:[#allocation42_spill] sm:$0xff] }
 0x1d6   :  { %v3039_v26 = vpop.permute.xlu1 %1047  ;;  %v3041_v15 = vpop.permute.xlu0 %1082  ;;  %v975_v49 = vsub.f32 %v865_v7, %v920_v21  ;;  %v3877_v21 = vld [vmem:[#allocation23_spill] sm:$0xff]  ;;  %v871_v7 = vld [vmem:[%s3730_s2 + $0xf8] sm:$0xff] }
 0x1d7   :  { %1422 = vperm.xlu1 %1726, %v967_v22   ;;  %1457 = vperm.xlu0 %1725, %v974_v39   ;;  %v927_v22 = vmul.f32 %v3867_v29, %v3866_v58  ;;  %v933_v58 = vmul.f32 %v2825_v18, %v3877_v21  ;;  %v3880_v18 = vld [vmem:[#allocation25_spill] sm:$0xff] }
 0x1d9   :  { %v982_v55 = vsub.f32 %v872_v17, %v927_v22  ;;  %v878_v17 = vld [vmem:[%s3730_s2 + $0x130] sm:$0xff] }
 0x1da   :  { %v3053_v23 = vpop.permute.xlu1 %1057  ;;  %v3055_v63 = vpop.permute.xlu0 %1092 }
 0x1db   :  { %1432 = vperm.xlu1 %1726, %v969_v14   ;;  %1467 = vperm.xlu0 %1725, %v976_v30   ;;  %v922_v14 = vmul.f32 %v3869_v32, %v3868_v61  ;;  %v3870_v30 = vld [vmem:[#allocation19_spill] sm:$0xff]  ;;  %v3878_v61 = vld [vmem:[#allocation18_spill] sm:$0xff]  ;;  %v3879_v32 = vld [vmem:[#allocation44_spill] sm:$0xff] }
 0x1dc   :  { %v929_v8 = vmul.f32 %v2801_v28, %v3870_v30  ;;  %v3873_v28 = vld [vmem:[#allocation21_spill] sm:$0xff]  ;;  %v935_v30 = vmul.f32 %v2837_v40, %v3880_v18  ;;  %v3883_v40 = vld [vmem:[#allocation27_spill] sm:$0xff] }
 0x1dd   :  { %v977_v37 = vsub.f32 %v867_v0, %v922_v14  ;;  %v931_v46 = vmul.f32 %v3874_v2, %v3873_v28  ;;  %v928_v14 = vmul.f32 %v3879_v32, %v3878_v61  ;;  %v937_v2 = vmul.f32 %v2849_v20, %v3883_v40  ;;  %v3886_v20 = vld [vmem:[#allocation29_spill] sm:$0xff]  ;;  %v3890_v40 = vld [vmem:[#allocation26_spill] sm:$0xff] }
 0x1de   :  { %v3067_v6 = vpop.permute.xlu1 %1067  ;;  %v3069_v38 = vpop.permute.xlu0 %1102  ;;  %v984_v34 = vsub.f32 %v874_v19, %v929_v8  ;;  %v873_v19 = vld [vmem:[%s3730_s2 + $0x108] sm:$0xff]  ;;  %v3888_v18 = vld [vmem:[#allocation49_spill] sm:$0xff] }
 0x1df   :  { %1442 = vperm.xlu1 %1726, %v971_v33   ;;  %1477 = vperm.xlu0 %1725, %v978_v10   ;;  %v3871_v33 = vld [vmem:[#allocation14_spill] sm:$0xff]  ;;  %v3872_v10 = vld [vmem:[#allocation41_spill] sm:$0xff] }
 0x1e0   :  { %v924_v31 = vmul.f32 %v3872_v10, %v3871_v33  ;;  %v3881_v10 = vld [vmem:[#allocation20_spill] sm:$0xff] }
 0x1e2   :  { %v3081_v39 = vpop.permute.xlu1 %1077  ;;  %v3083_v54 = vpop.permute.xlu0 %1112  ;;  %v979_v13 = vsub.f32 %v869_v35, %v924_v31  ;;  %v3882_v31 = vld [vmem:[#allocation45_spill] sm:$0xff] }
 0x1e3   :  { %1452 = vperm.xlu1 %1726, %v973_v16   ;;  %1487 = vperm.xlu0 %1725, %v980_v47   ;;  %v986_v16 = vsub.f32 %v876_v12, %v931_v46  ;;  %v3875_v47 = vld [vmem:[#allocation16_spill] sm:$0xff]  ;;  %v930_v28 = vmul.f32 %v3882_v31, %v3881_v10  ;;  %v875_v12 = vld [vmem:[%s3730_s2 + $0x118] sm:$0xff] }
 0x1e4   :  { %v926_v62 = vmul.f32 %v3876_v1, %v3875_v47  ;;  %v3884_v1 = vld [vmem:[#allocation22_spill] sm:$0xff]  ;;  %v886_v10 = vld [vmem:[%s3730_s2 + $0x170] sm:$0xff] }
 0x1e6   :  { %v3095_v4 = vpop.permute.xlu1 %1087  ;;  %v3097_v48 = vpop.permute.xlu0 %1122 }
 0x1e7   :  { %1462 = vperm.xlu1 %1726, %v975_v49   ;;  %1497 = vperm.xlu0 %1725, %v982_v55   ;;  %v981_v49 = vsub.f32 %v871_v7, %v926_v62  ;;  %v988_v55 = vsub.f32 %v878_v17, %v933_v58  ;;  %v3885_v62 = vld [vmem:[#allocation47_spill] sm:$0xff]  ;;  %v939_v58 = vmul.f32 %v2861_v45, %v3886_v20 }
 0x1e8   :  { %v932_v21 = vmul.f32 %v3885_v62, %v3884_v1  ;;  %v3889_v45 = vld [vmem:[#allocation31_spill] sm:$0xff]  ;;  %v888_v62 = vld [vmem:[%s3730_s2 + $0x180] sm:$0xff] }
 0x1e9   :  { %v881_v1 = vld [vmem:[%s3730_s2 + $0x148] sm:$0xff] }
 0x1ea   :  { %v3109_v41 = vpop.permute.xlu1 %1097  ;;  %v3111_v5 = vpop.permute.xlu0 %1132 }
 0x1eb   :  { %1472 = vperm.xlu1 %1726, %v977_v37   ;;  %1507 = vperm.xlu0 %1725, %v984_v34   ;;  %v880_v37 = vld [vmem:[%s3730_s2 + $0x140] sm:$0xff]  ;;  %v983_v34 = vsub.f32 %v873_v19, %v928_v14  ;;  %v3887_v14 = vld [vmem:[#allocation24_spill] sm:$0xff]  ;;  %v941_v19 = vmul.f32 %v2873_v51, %v3889_v45  ;;  %v3892_v51 = vld [vmem:[#allocation33_spill] sm:$0xff] }
 0x1ec   :  { %v990_v33 = vsub.f32 %v880_v37, %v935_v30  ;;  %v934_v30 = vmul.f32 %v3888_v18, %v3887_v14  ;;  %v883_v18 = vld [vmem:[%s3730_s2 + $0x158] sm:$0xff] }
 0x1ee   :  { %v3123_v29 = vpop.permute.xlu1 %1107  ;;  %v3125_v22 = vpop.permute.xlu0 %1142 }
 0x1ef   :  { %1482 = vperm.xlu1 %1726, %v979_v13   ;;  %1517 = vperm.xlu0 %1725, %v986_v16   ;;  %v882_v13 = vld [vmem:[%s3730_s2 + $0x150] sm:$0xff]  ;;  %v985_v16 = vsub.f32 %v875_v12, %v930_v28  ;;  %v996_v28 = vsub.f32 %v886_v10, %v941_v19  ;;  %v3897_v10 = vld [vmem:[#allocation53_spill] sm:$0xff] }
 0x1f0   :  { %v992_v47 = vsub.f32 %v882_v13, %v937_v2  ;;  %v3891_v2 = vld [vmem:[#allocation50_spill] sm:$0xff]  ;;  %v943_v13 = vmul.f32 %v2887_v9, %v3892_v51  ;;  %v3895_v9 = vld [vmem:[#allocation35_spill] sm:$0xff] }
 0x1f1   :  { %v936_v12 = vmul.f32 %v3891_v2, %v3890_v40  ;;  %v892_v51 = vld [vmem:[%s3730_s2 + $0x1a0] sm:$0xff] }
 0x1f2   :  { %v3137_v8 = vpop.permute.xlu1 %1117  ;;  %v3139_v0 = vpop.permute.xlu0 %1152  ;;  %v998_v20 = vsub.f32 %v888_v62, %v943_v13  ;;  %v3899_v62 = vld [vmem:[#allocation32_spill] sm:$0xff] }
 0x1f3   :  { %1492 = vperm.xlu1 %1726, %v981_v49   ;;  %1527 = vperm.xlu0 %1725, %v988_v55   ;;  %v877_v49 = vld [vmem:[%s3730_s2 + $0x128] sm:$0xff]  ;;  %v884_v55 = vld [vmem:[%s3730_s2 + $0x160] sm:$0xff] }
 0x1f4   :  { %v987_v61 = vsub.f32 %v877_v49, %v932_v21  ;;  %v994_v32 = vsub.f32 %v884_v55, %v939_v58  ;;  %v991_v21 = vsub.f32 %v881_v1, %v936_v12  ;;  %v3893_v58 = vld [vmem:[#allocation28_spill] sm:$0xff]  ;;  %v885_v12 = vld [vmem:[%s3730_s2 + $0x168] sm:$0xff] }
 0x1f5   :  { %v3894_v49 = vld [vmem:[#allocation52_spill] sm:$0xff] }
 0x1f6   :  { %v3151_v46 = vpop.permute.xlu1 %1127  ;;  %v3153_v35 = vpop.permute.xlu0 %1162  ;;  %v938_v55 = vmul.f32 %v3894_v49, %v3893_v58 }
 0x1f7   :  { %1502 = vperm.xlu1 %1726, %v983_v34   ;;  %1537 = vperm.xlu0 %1725, %v990_v33   ;;  %v879_v33 = vld [vmem:[%s3730_s2 + $0x138] sm:$0xff] }
 0x1f8   :  { %v989_v31 = vsub.f32 %v879_v33, %v934_v30  ;;  %v890_v30 = vld [vmem:[%s3730_s2 + $0x190] sm:$0xff]  ;;  %v993_v45 = vsub.f32 %v883_v18, %v938_v55  ;;  %v3896_v33 = vld [vmem:[#allocation30_spill] sm:$0xff] }
 0x1fa   :  { %v3165_v7 = vpop.permute.xlu1 %1137  ;;  %v3167_v17 = vpop.permute.xlu0 %1172 }
 0x1fb   :  { %1512 = vperm.xlu1 %1726, %v985_v16   ;;  %1547 = vperm.xlu0 %1725, %v992_v47  }
 0x1fe   :  { %v3179_v37 = vpop.permute.xlu1 %1147  ;;  %v3181_v34 = vpop.permute.xlu0 %1182 }
 0x1ff   :  { %1522 = vperm.xlu1 %1726, %v987_v61   ;;  %1557 = vperm.xlu0 %1725, %v994_v32   ;;  %v945_v61 = vmul.f32 %v2898_v3, %v3895_v9  ;;  %v3898_v3 = vld [vmem:[#allocation2_spill] sm:$0xff]  ;;  %v887_v9 = vld [vmem:[%s3730_s2 + $0x178] sm:$0xff] }
 0x201   :  { %v1000_v19 = vsub.f32 %v890_v30, %v945_v61  ;;  %v894_v61 = vld [vmem:[%s3730_s2 + $0x1b0] sm:$0xff] }
 0x202   :  { %v3193_v16 = vpop.permute.xlu1 %1157  ;;  %v3195_v47 = vpop.permute.xlu0 %1192 }
 0x203   :  { %1532 = vperm.xlu1 %1726, %v989_v31   ;;  %1567 = vperm.xlu0 %1725, %v996_v28   ;;  %v940_v31 = vmul.f32 %v3897_v10, %v3896_v33  ;;  %v947_v28 = vmul.f32 %v2909_v24, %v3898_v3  ;;  %v3901_v24 = vld [vmem:[#allocation3_spill] sm:$0xff] }
 0x204   :  { %v949_v58 = vmul.f32 %v2920_v44, %v3901_v24 }
 0x205   :  { %v995_v13 = vsub.f32 %v885_v12, %v940_v31  ;;  %v1002_v1 = vsub.f32 %v892_v51, %v947_v28  ;;  %v889_v31 = vld [vmem:[%s3730_s2 + $0x188] sm:$0xff]  ;;  %v3904_v28 = vld [vmem:[#allocation36_spill] sm:$0xff] }
 0x206   :  { %v3207_v32 = vpop.permute.xlu1 %1167  ;;  %v3209_v14 = vpop.permute.xlu0 %1202  ;;  %v1004_v30 = vsub.f32 %v894_v61, %v949_v58  ;;  %v946_v12 = vmul.f32 %v2863_v36, %v3904_v28  ;;  %v893_v36 = vld [vmem:[%s3730_s2 + $0x1a8] sm:$0xff]  ;;  %v1838_v28 = vld [vmem:[%s3728_s0 + $0x10] sm:$0xff] }
 0x207   :  { %1542 = vperm.xlu1 %1726, %v991_v21   ;;  %1577 = vperm.xlu0 %1725, %v998_v20   ;;  %v3900_v21 = vld [vmem:[#allocation54_spill] sm:$0xff] }
 0x208   :  { %v942_v20 = vmul.f32 %v3900_v21, %v3899_v62  ;;  %v3905_v21 = vld [vmem:[#allocation37_spill] sm:$0xff] }
 0x20a   :  { %v3221_v40 = vpop.permute.xlu1 %1177  ;;  %v3223_v2 = vpop.permute.xlu0 %1212  ;;  %v997_v18 = vsub.f32 %v887_v9, %v942_v20  ;;  %v948_v20 = vmul.f32 %v2875_v25, %v3905_v21  ;;  %v1837_v25 = vld [vmem:[%s3728_s0] sm:$0xff] }
 0x20b   :  { %1552 = vperm.xlu1 %1726, %v993_v45   ;;  %1587 = vperm.xlu0 %1725, %v1000_v19   ;;  %v3902_v45 = vld [vmem:[#allocation34_spill] sm:$0xff]  ;;  %v3903_v19 = vld [vmem:[#allocation55_spill] sm:$0xff] }
 0x20c   :  { %v944_v33 = vmul.f32 %v3903_v19, %v3902_v45  ;;  %v1003_v9 = vsub.f32 %v893_v36, %v948_v20  ;;  %v1280_v19 = vmul.f32 %v1837_v25, %v2983_v60  ;;  %v1839_v60 = vld [vmem:[%s3728_s0 + $0x20] sm:$0xff]  ;;  %v1840_v25 = vld [vmem:[%s3728_s0 + $0x30] sm:$0xff] }
 0x20d   :  { %v1284_v20 = vmul.f32 %v1839_v60, %v2985_v42 }
 0x20e   :  { %v3235_v49 = vpop.permute.xlu1 %1187  ;;  %v3237_v55 = vpop.permute.xlu0 %1222  ;;  %v999_v3 = vsub.f32 %v889_v31, %v944_v33 }
 0x20f   :  { %1562 = vperm.xlu1 %1726, %v995_v13   ;;  %1597 = vperm.xlu0 %1725, %v1002_v1   ;;  %v891_v1 = vld [vmem:[%s3730_s2 + $0x198] sm:$0xff] }
 0x210   :  { %v1001_v62 = vsub.f32 %v891_v1, %v946_v12  ;;  %v1282_v12 = vmul.f32 %v1838_v28, %v2959_v59  ;;  %v1841_v28 = vld [vmem:[%s3728_s0 + $0x8] sm:$0xff] }
 0x212   :  { %v3247_v44 = vpop.permute.xlu1 %1197  ;;  %v3249_v10 = vpop.permute.xlu0 %1232 }
 0x213   :  { %1572 = vperm.xlu1 %1726, %v997_v18   ;;  %1607 = vperm.xlu0 %1725, %v1004_v30  }
 0x216   :  { %v3256_v51 = vpop.permute.xlu1 %1207  ;;  %v3258_v13 = vpop.permute.xlu0 %1242 }
 0x217   :  { %1582 = vperm.xlu1 %1726, %v999_v3  }
 0x21a   :  { %v3265_v24 = vpop.permute.xlu1 %1217  ;;  %v3267_v58 = vpop.permute.xlu0 %1252 }
 0x21b   :  { %1592 = vperm.xlu1 %1726, %v1001_v62  }
 0x21e   :  { %v3272_v61 = vpop.permute.xlu1 %1227  ;;  %v3274_v18 = vpop.permute.xlu0 %1262 }
 0x21f   :  { %1602 = vperm.xlu1 %1726, %v1003_v9  }
 0x222   :  { %v3276_v30 = vpop.permute.xlu1 %1237  ;;  %v3278_v45 = vpop.permute.xlu0 %1272 }
 0x226   :  { %v3284_v33 = vpop.permute.xlu1 %1247  ;;  %v1338_v31 = vpop.permute.xlu0 %1337 }
 0x227   :  { %v1610_v3 = vadd.f32 %v1338_v31, %v1280_v19  ;;  %v1286_v19 = vmul.f32 %v1840_v25, %v3011_v43  ;;  %v1844_v25 = vld [vmem:[%s3728_s0 + $0x50] sm:$0xff] }
 0x229   :  { %1665 = vst.msk [vmem:[%s3731_s3] sm:$0xff] %vm69_vm0, %v1610_v3 }
 0x22a   :  { %v3294_v1 = vpop.permute.xlu1 %1257  ;;  %v1348_v62 = vpop.permute.xlu0 %1347 }
 0x22b   :  { %v1612_v21 = vadd.f32 %v1348_v62, %v1282_v12  ;;  %v1281_v12 = vmul.f32 %v1841_v28, %v2947_v52  ;;  %v1842_v62 = vld [vmem:[%s3728_s0 + $0x40] sm:$0xff]  ;;  %v1845_v28 = vld [vmem:[%s3728_s0 + $0x28] sm:$0xff] }
 0x22c   :  { %v1288_v43 = vmul.f32 %v1842_v62, %v3039_v26  ;;  %v1290_v26 = vmul.f32 %v1844_v25, %v3053_v23  ;;  %v1285_v23 = vmul.f32 %v1845_v28, %v2997_v50 }
 0x22d   :  { %1667 = vst.msk [vmem:[%s3731_s3 + $0x10] sm:$0xff] %vm69_vm0, %v1612_v21 }
 0x22e   :  { %v3304_v59 = vpop.permute.xlu1 %1267  ;;  %v1358_v36 = vpop.permute.xlu0 %1357 }
 0x22f   :  { %v1614_v9 = vadd.f32 %v1358_v36, %v1284_v20 }
 0x231   :  { %1669 = vst.msk [vmem:[%s3731_s3 + $0x20] sm:$0xff] %vm69_vm0, %v1614_v9  ;;  %v1843_v9 = vld [vmem:[%s3728_s0 + $0x18] sm:$0xff] }
 0x232   :  { %v3314_v42 = vpop.permute.xlu1 %1277  ;;  %v1368_v31 = vpop.permute.xlu0 %1367  ;;  %v1283_v52 = vmul.f32 %v1843_v9, %v2971_v56 }
 0x233   :  { %v1616_v3 = vadd.f32 %v1368_v31, %v1286_v19 }
 0x235   :  { %1671 = vst.msk [vmem:[%s3731_s3 + $0x30] sm:$0xff] %vm69_vm0, %v1616_v3 }
 0x236   :  { %v1343_v21 = vpop.permute.xlu1 %1342  ;;  %v1378_v60 = vpop.permute.xlu0 %1377 }
 0x237   :  { %v1611_v20 = vadd.f32 %v1343_v21, %v1281_v12  ;;  %v1618_v36 = vadd.f32 %v1378_v60, %v1288_v43  ;;  %v1846_v12 = vld [vmem:[%s3728_s0 + $0x60] sm:$0xff] }
 0x238   :  { %v1292_v62 = vmul.f32 %v1846_v12, %v3067_v6  ;;  %v1851_v12 = vld [vmem:[%s3728_s0 + $0x58] sm:$0xff] }
 0x239   :  { %1666 = vst.msk [vmem:[%s3731_s3 + $0x8] sm:$0xff] %vm69_vm0, %v1611_v20  ;;  %1673 = vst.msk [vmem:[%s3731_s3 + $0x40] sm:$0xff] %vm69_vm0, %v1618_v36  ;;  %v1847_v20 = vld [vmem:[%s3728_s0 + $0x38] sm:$0xff]  ;;  %v1848_v36 = vld [vmem:[%s3728_s0 + $0x70] sm:$0xff] }
 0x23a   :  { %v1353_v19 = vpop.permute.xlu1 %1352  ;;  %v1388_v31 = vpop.permute.xlu0 %1387  ;;  %v1287_v6 = vmul.f32 %v1847_v20, %v3025_v11  ;;  %v1294_v9 = vmul.f32 %v1848_v36, %v3081_v39  ;;  %v1853_v20 = vld [vmem:[%s3728_s0 + $0x68] sm:$0xff] }
 0x23b   :  { %v1613_v3 = vadd.f32 %v1353_v19, %v1283_v52  ;;  %v1620_v56 = vadd.f32 %v1388_v31, %v1290_v26  ;;  %v1849_v19 = vld [vmem:[%s3728_s0 + $0x48] sm:$0xff]  ;;  %v1850_v31 = vld [vmem:[%s3728_s0 + $0x80] sm:$0xff] }
 0x23c   :  { %v1289_v39 = vmul.f32 %v1849_v19, %v2999_v27 }
 0x23d   :  { %1668 = vst.msk [vmem:[%s3731_s3 + $0x18] sm:$0xff] %vm69_vm0, %v1613_v3  ;;  %1675 = vst.msk [vmem:[%s3731_s3 + $0x50] sm:$0xff] %vm69_vm0, %v1620_v56  ;;  %v1296_v3 = vmul.f32 %v1850_v31, %v3095_v4  ;;  %v1291_v4 = vmul.f32 %v1851_v12, %v3013_v57 }
 0x23e   :  { %v1363_v43 = vpop.permute.xlu1 %1362  ;;  %v1398_v21 = vpop.permute.xlu0 %1397 }
 0x23f   :  { %v1615_v60 = vadd.f32 %v1363_v43, %v1285_v23  ;;  %v1622_v50 = vadd.f32 %v1398_v21, %v1292_v62  ;;  %v1852_v62 = vld [vmem:[%s3728_s0 + $0x90] sm:$0xff] }
 0x240   :  { %v1298_v43 = vmul.f32 %v1852_v62, %v3109_v41  ;;  %v1293_v41 = vmul.f32 %v1853_v20, %v3027_v53  ;;  %v1859_v62 = vld [vmem:[%s3728_s0 + $0x98] sm:$0xff]  ;;  %v1861_v20 = vld [vmem:[%s3728_s0 + $0xa8] sm:$0xff] }
 0x241   :  { %1670 = vst.msk [vmem:[%s3731_s3 + $0x28] sm:$0xff] %vm69_vm0, %v1615_v60  ;;  %1677 = vst.msk [vmem:[%s3731_s3 + $0x60] sm:$0xff] %vm69_vm0, %v1622_v50 }
 0x242   :  { %v1373_v52 = vpop.permute.xlu1 %1372  ;;  %v1408_v25 = vpop.permute.xlu0 %1407 }
 0x243   :  { %v1617_v26 = vadd.f32 %v1373_v52, %v1287_v6  ;;  %v1624_v11 = vadd.f32 %v1408_v25, %v1294_v9  ;;  %v1854_v6 = vld [vmem:[%s3728_s0 + $0xa0] sm:$0xff] }
 0x244   :  { %v1300_v36 = vmul.f32 %v1854_v6, %v3123_v29 }
 0x245   :  { %1672 = vst.msk [vmem:[%s3731_s3 + $0x38] sm:$0xff] %vm69_vm0, %v1617_v26  ;;  %1679 = vst.msk [vmem:[%s3731_s3 + $0x70] sm:$0xff] %vm69_vm0, %v1624_v11  ;;  %v1855_v26 = vld [vmem:[%s3728_s0 + $0x78] sm:$0xff]  ;;  %v1856_v11 = vld [vmem:[%s3728_s0 + $0xb0] sm:$0xff] }
 0x246   :  { %v1383_v56 = vpop.permute.xlu1 %1382  ;;  %v1418_v28 = vpop.permute.xlu0 %1417  ;;  %v1295_v29 = vmul.f32 %v1855_v26, %v3041_v15  ;;  %v1302_v19 = vmul.f32 %v1856_v11, %v3137_v8 }
 0x247   :  { %v1619_v23 = vadd.f32 %v1383_v56, %v1289_v39  ;;  %v1626_v27 = vadd.f32 %v1418_v28, %v1296_v3  ;;  %v1857_v56 = vld [vmem:[%s3728_s0 + $0x88] sm:$0xff]  ;;  %v1858_v28 = vld [vmem:[%s3728_s0 + $0xc0] sm:$0xff] }
 0x248   :  { %v1297_v8 = vmul.f32 %v1857_v56, %v3055_v63 }
 0x249   :  { %1674 = vst.msk [vmem:[%s3731_s3 + $0x48] sm:$0xff] %vm69_vm0, %v1619_v23  ;;  %1681 = vst.msk [vmem:[%s3731_s3 + $0x80] sm:$0xff] %vm69_vm0, %v1626_v27  ;;  %v1304_v23 = vmul.f32 %v1858_v28, %v3151_v46  ;;  %v1299_v46 = vmul.f32 %v1859_v62, %v3069_v38  ;;  %v1867_v28 = vld [vmem:[%s3728_s0 + $0xd8] sm:$0xff]  ;;  %v1869_v62 = vld [vmem:[%s3728_s0 + $0xe8] sm:$0xff] }
 0x24a   :  { %v1393_v21 = vpop.permute.xlu1 %1392  ;;  %v1428_v60 = vpop.permute.xlu0 %1427 }
 0x24b   :  { %v1621_v50 = vadd.f32 %v1393_v21, %v1291_v4  ;;  %v1628_v57 = vadd.f32 %v1428_v60, %v1298_v43  ;;  %v1860_v43 = vld [vmem:[%s3728_s0 + $0xd0] sm:$0xff] }
 0x24c   :  { %v1306_v21 = vmul.f32 %v1860_v43, %v3165_v7  ;;  %v1301_v7 = vmul.f32 %v1861_v20, %v3083_v54 }
 0x24d   :  { %1676 = vst.msk [vmem:[%s3731_s3 + $0x58] sm:$0xff] %vm69_vm0, %v1621_v50  ;;  %1683 = vst.msk [vmem:[%s3731_s3 + $0x90] sm:$0xff] %vm69_vm0, %v1628_v57 }
 0x24e   :  { %v1403_v9 = vpop.permute.xlu1 %1402  ;;  %v1438_v52 = vpop.permute.xlu0 %1437 }
 0x24f   :  { %v1623_v25 = vadd.f32 %v1403_v9, %v1293_v41  ;;  %v1630_v53 = vadd.f32 %v1438_v52, %v1300_v36  ;;  %v1862_v41 = vld [vmem:[%s3728_s0 + $0xe0] sm:$0xff] }
 0x250   :  { %v1308_v6 = vmul.f32 %v1862_v41, %v3179_v37 }
 0x251   :  { %1678 = vst.msk [vmem:[%s3731_s3 + $0x68] sm:$0xff] %vm69_vm0, %v1623_v25  ;;  %1685 = vst.msk [vmem:[%s3731_s3 + $0xa0] sm:$0xff] %vm69_vm0, %v1630_v53  ;;  %v1863_v25 = vld [vmem:[%s3728_s0 + $0xb8] sm:$0xff]  ;;  %v1864_v53 = vld [vmem:[%s3728_s0 + $0xf0] sm:$0xff] }
 0x252   :  { %v1413_v39 = vpop.permute.xlu1 %1412  ;;  %v1448_v31 = vpop.permute.xlu0 %1447  ;;  %v1303_v37 = vmul.f32 %v1863_v25, %v3097_v48  ;;  %v1310_v26 = vmul.f32 %v1864_v53, %v3193_v16  ;;  %v1875_v53 = vld [vmem:[%s3728_s0 + $0x118] sm:$0xff] }
 0x253   :  { %v1625_v3 = vadd.f32 %v1413_v39, %v1295_v29  ;;  %v1632_v15 = vadd.f32 %v1448_v31, %v1302_v19  ;;  %v1865_v39 = vld [vmem:[%s3728_s0 + $0xc8] sm:$0xff]  ;;  %v1866_v31 = vld [vmem:[%s3728_s0 + $0x100] sm:$0xff] }
 0x254   :  { %v1305_v16 = vmul.f32 %v1865_v39, %v3111_v5  ;;  %v1877_v39 = vld [vmem:[%s3728_s0 + $0x128] sm:$0xff] }
 0x255   :  { %1680 = vst.msk [vmem:[%s3731_s3 + $0x78] sm:$0xff] %vm69_vm0, %v1625_v3  ;;  %1687 = vst.msk [vmem:[%s3731_s3 + $0xb0] sm:$0xff] %vm69_vm0, %v1632_v15  ;;  %v1312_v3 = vmul.f32 %v1866_v31, %v3207_v32  ;;  %v1307_v32 = vmul.f32 %v1867_v28, %v3125_v22 }
 0x256   :  { %v1423_v27 = vpop.permute.xlu1 %1422  ;;  %v1458_v12 = vpop.permute.xlu0 %1457 }
 0x257   :  { %v1627_v4 = vadd.f32 %v1423_v27, %v1297_v8  ;;  %v1634_v63 = vadd.f32 %v1458_v12, %v1304_v23  ;;  %v1868_v23 = vld [vmem:[%s3728_s0 + $0x110] sm:$0xff] }
 0x258   :  { %v1314_v27 = vmul.f32 %v1868_v23, %v3221_v40  ;;  %v1309_v40 = vmul.f32 %v1869_v62, %v3139_v0 }
 0x259   :  { %1682 = vst.msk [vmem:[%s3731_s3 + $0x88] sm:$0xff] %vm69_vm0, %v1627_v4  ;;  %1689 = vst.msk [vmem:[%s3731_s3 + $0xc0] sm:$0xff] %vm69_vm0, %v1634_v63 }
 0x25a   :  { %v1433_v60 = vpop.permute.xlu1 %1432  ;;  %v1468_v50 = vpop.permute.xlu0 %1467 }
 0x25b   :  { %v1629_v57 = vadd.f32 %v1433_v60, %v1299_v46  ;;  %v1636_v38 = vadd.f32 %v1468_v50, %v1306_v21  ;;  %v1870_v46 = vld [vmem:[%s3728_s0 + $0x120] sm:$0xff] }
 0x25c   :  { %v1316_v43 = vmul.f32 %v1870_v46, %v3235_v49  ;;  %v1883_v46 = vld [vmem:[%s3728_s0 + $0x158] sm:$0xff] }
 0x25d   :  { %1684 = vst.msk [vmem:[%s3731_s3 + $0x98] sm:$0xff] %vm69_vm0, %v1629_v57  ;;  %1691 = vst.msk [vmem:[%s3731_s3 + $0xd0] sm:$0xff] %vm69_vm0, %v1636_v38  ;;  %v1871_v57 = vld [vmem:[%s3728_s0 + $0xf8] sm:$0xff]  ;;  %v1872_v38 = vld [vmem:[%s3728_s0 + $0x130] sm:$0xff] }
 0x25e   :  { %v1443_v36 = vpop.permute.xlu1 %1442  ;;  %v1478_v9 = vpop.permute.xlu0 %1477  ;;  %v1311_v49 = vmul.f32 %v1871_v57, %v3153_v35  ;;  %v1318_v20 = vmul.f32 %v1872_v38, %v3247_v44  ;;  %v1885_v57 = vld [vmem:[%s3728_s0 + $0x168] sm:$0xff] }
 0x25f   :  { %v1631_v52 = vadd.f32 %v1443_v36, %v1301_v7  ;;  %v1638_v54 = vadd.f32 %v1478_v9, %v1308_v6  ;;  %v1873_v36 = vld [vmem:[%s3728_s0 + $0x108] sm:$0xff]  ;;  %v1874_v9 = vld [vmem:[%s3728_s0 + $0x140] sm:$0xff] }
 0x260   :  { %v1313_v44 = vmul.f32 %v1873_v36, %v3167_v17 }
 0x261   :  { %1686 = vst.msk [vmem:[%s3731_s3 + $0xa8] sm:$0xff] %vm69_vm0, %v1631_v52  ;;  %1693 = vst.msk [vmem:[%s3731_s3 + $0xe0] sm:$0xff] %vm69_vm0, %v1638_v54  ;;  %v1320_v52 = vmul.f32 %v1874_v9, %v3256_v51  ;;  %v1315_v51 = vmul.f32 %v1875_v53, %v3181_v34 }
 0x262   :  { %v1453_v29 = vpop.permute.xlu1 %1452  ;;  %v1488_v11 = vpop.permute.xlu0 %1487 }
 0x263   :  { %v1633_v19 = vadd.f32 %v1453_v29, %v1303_v37  ;;  %v1640_v48 = vadd.f32 %v1488_v11, %v1310_v26  ;;  %v1876_v26 = vld [vmem:[%s3728_s0 + $0x150] sm:$0xff] }
 0x264   :  { %v1322_v29 = vmul.f32 %v1876_v26, %v3265_v24  ;;  %v1317_v24 = vmul.f32 %v1877_v39, %v3195_v47  ;;  %v1891_v26 = vld [vmem:[%s3728_s0 + $0x1a8] sm:$0xff] }
 0x265   :  { %1688 = vst.msk [vmem:[%s3731_s3 + $0xb8] sm:$0xff] %vm69_vm0, %v1633_v19  ;;  %1695 = vst.msk [vmem:[%s3731_s3 + $0xf0] sm:$0xff] %vm69_vm0, %v1640_v48 }
 0x266   :  { %v1463_v15 = vpop.permute.xlu1 %1462  ;;  %v1498_v56 = vpop.permute.xlu0 %1497 }
 0x267   :  { %v1635_v8 = vadd.f32 %v1463_v15, %v1305_v16  ;;  %v1642_v5 = vadd.f32 %v1498_v56, %v1312_v3  ;;  %v1878_v16 = vld [vmem:[%s3728_s0 + $0x160] sm:$0xff] }
 0x268   :  { %v1324_v31 = vmul.f32 %v1878_v16, %v3272_v61 }
 0x269   :  { %1690 = vst.msk [vmem:[%s3731_s3 + $0xc8] sm:$0xff] %vm69_vm0, %v1635_v8  ;;  %1697 = vst.msk [vmem:[%s3731_s3 + $0x100] sm:$0xff] %vm69_vm0, %v1642_v5  ;;  %v1879_v8 = vld [vmem:[%s3728_s0 + $0x138] sm:$0xff]  ;;  %v1880_v5 = vld [vmem:[%s3728_s0 + $0x170] sm:$0xff] }
 0x26a   :  { %v1473_v12 = vpop.permute.xlu1 %1472  ;;  %v1508_v4 = vpop.permute.xlu0 %1507  ;;  %v1319_v61 = vmul.f32 %v1879_v8, %v3209_v14  ;;  %v1326_v28 = vmul.f32 %v1880_v5, %v3276_v30 }
 0x26b   :  { %v1637_v63 = vadd.f32 %v1473_v12, %v1307_v32  ;;  %v1644_v22 = vadd.f32 %v1508_v4, %v1314_v27  ;;  %v1881_v12 = vld [vmem:[%s3728_s0 + $0x148] sm:$0xff]  ;;  %v1882_v4 = vld [vmem:[%s3728_s0 + $0x180] sm:$0xff] }
 0x26c   :  { %v1321_v30 = vmul.f32 %v1881_v12, %v3223_v2 }
 0x26d   :  { %1692 = vst.msk [vmem:[%s3731_s3 + $0xd8] sm:$0xff] %vm69_vm0, %v1637_v63  ;;  %1699 = vst.msk [vmem:[%s3731_s3 + $0x110] sm:$0xff] %vm69_vm0, %v1644_v22  ;;  %v1328_v63 = vmul.f32 %v1882_v4, %v3284_v33  ;;  %v1323_v33 = vmul.f32 %v1883_v46, %v3237_v55 }
 0x26e   :  { %v1483_v21 = vpop.permute.xlu1 %1482  ;;  %v1518_v60 = vpop.permute.xlu0 %1517 }
 0x26f   :  { %v1639_v50 = vadd.f32 %v1483_v21, %v1309_v40  ;;  %v1646_v0 = vadd.f32 %v1518_v60, %v1316_v43  ;;  %v1884_v43 = vld [vmem:[%s3728_s0 + $0x190] sm:$0xff] }
 0x270   :  { %v1330_v21 = vmul.f32 %v1884_v43, %v3294_v1  ;;  %v1325_v1 = vmul.f32 %v1885_v57, %v3249_v10 }
 0x271   :  { %1694 = vst.msk [vmem:[%s3731_s3 + $0xe8] sm:$0xff] %vm69_vm0, %v1639_v50  ;;  %1701 = vst.msk [vmem:[%s3731_s3 + $0x120] sm:$0xff] %vm69_vm0, %v1646_v0 }
 0x272   :  { %v1493_v7 = vpop.permute.xlu1 %1492  ;;  %v1528_v41 = vpop.permute.xlu0 %1527 }
 0x273   :  { %v1641_v6 = vadd.f32 %v1493_v7, %v1311_v49  ;;  %v1648_v35 = vadd.f32 %v1528_v41, %v1318_v20  ;;  %v1886_v49 = vld [vmem:[%s3728_s0 + $0x1a0] sm:$0xff] }
 0x274   :  { %v1332_v38 = vmul.f32 %v1886_v49, %v3304_v59 }
 0x275   :  { %1696 = vst.msk [vmem:[%s3731_s3 + $0xf8] sm:$0xff] %vm69_vm0, %v1641_v6  ;;  %1703 = vst.msk [vmem:[%s3731_s3 + $0x130] sm:$0xff] %vm69_vm0, %v1648_v35  ;;  %v1887_v6 = vld [vmem:[%s3728_s0 + $0x178] sm:$0xff]  ;;  %v1888_v35 = vld [vmem:[%s3728_s0 + $0x1b0] sm:$0xff] }
 0x276   :  { %v1503_v54 = vpop.permute.xlu1 %1502  ;;  %v1538_v25 = vpop.permute.xlu0 %1537  ;;  %v1327_v59 = vmul.f32 %v1887_v6, %v3258_v13  ;;  %v1334_v36 = vmul.f32 %v1888_v35, %v3314_v42 }
 0x277   :  { %v1643_v37 = vadd.f32 %v1503_v54, %v1313_v44  ;;  %v1650_v17 = vadd.f32 %v1538_v25, %v1320_v52  ;;  %v1889_v54 = vld [vmem:[%s3728_s0 + $0x188] sm:$0xff] }
 0x278   :  { %v1329_v42 = vmul.f32 %v1889_v54, %v3267_v58 }
 0x279   :  { %1698 = vst.msk [vmem:[%s3731_s3 + $0x108] sm:$0xff] %vm69_vm0, %v1643_v37  ;;  %1705 = vst.msk [vmem:[%s3731_s3 + $0x140] sm:$0xff] %vm69_vm0, %v1650_v17  ;;  %v1890_v17 = vld [vmem:[%s3728_s0 + $0x198] sm:$0xff] }
 0x27a   :  { %v1513_v11 = vpop.permute.xlu1 %1512  ;;  %v1548_v19 = vpop.permute.xlu0 %1547  ;;  %v1331_v53 = vmul.f32 %v1890_v17, %v3274_v18 }
 0x27b   :  { %v1645_v48 = vadd.f32 %v1513_v11, %v1315_v51  ;;  %v1652_v34 = vadd.f32 %v1548_v19, %v1322_v29  ;;  %v1333_v29 = vmul.f32 %v1891_v26, %v3278_v45 }
 0x27d   :  { %1700 = vst.msk [vmem:[%s3731_s3 + $0x118] sm:$0xff] %vm69_vm0, %v1645_v48  ;;  %1707 = vst.msk [vmem:[%s3731_s3 + $0x150] sm:$0xff] %vm69_vm0, %v1652_v34 }
 0x27e   :  { %v1523_v3 = vpop.permute.xlu1 %1522  ;;  %v1558_v15 = vpop.permute.xlu0 %1557 }
 0x27f   :  { %v1647_v56 = vadd.f32 %v1523_v3, %v1317_v24  ;;  %v1654_v47 = vadd.f32 %v1558_v15, %v1324_v31 }
 0x281   :  { %1702 = vst.msk [vmem:[%s3731_s3 + $0x128] sm:$0xff] %vm69_vm0, %v1647_v56  ;;  %1709 = vst.msk [vmem:[%s3731_s3 + $0x160] sm:$0xff] %vm69_vm0, %v1654_v47 }
 0x282   :  { %v1533_v32 = vpop.permute.xlu1 %1532  ;;  %v1568_v23 = vpop.permute.xlu0 %1567 }
 0x283   :  { %v1649_v27 = vadd.f32 %v1533_v32, %v1319_v61  ;;  %v1656_v14 = vadd.f32 %v1568_v23, %v1326_v28 }
 0x285   :  { %1704 = vst.msk [vmem:[%s3731_s3 + $0x138] sm:$0xff] %vm69_vm0, %v1649_v27  ;;  %1711 = vst.msk [vmem:[%s3731_s3 + $0x170] sm:$0xff] %vm69_vm0, %v1656_v14 }
 0x286   :  { %v1543_v22 = vpop.permute.xlu1 %1542  ;;  %v1578_v62 = vpop.permute.xlu0 %1577 }
 0x287   :  { %v1651_v40 = vadd.f32 %v1543_v22, %v1321_v30  ;;  %v1658_v2 = vadd.f32 %v1578_v62, %v1328_v63 }
 0x289   :  { %1706 = vst.msk [vmem:[%s3731_s3 + $0x148] sm:$0xff] %vm69_vm0, %v1651_v40  ;;  %1713 = vst.msk [vmem:[%s3731_s3 + $0x180] sm:$0xff] %vm69_vm0, %v1658_v2 }
 0x28a   :  { %v1553_v60 = vpop.permute.xlu1 %1552  ;;  %v1588_v50 = vpop.permute.xlu0 %1587 }
 0x28b   :  { %v1653_v0 = vadd.f32 %v1553_v60, %v1323_v33  ;;  %v1660_v55 = vadd.f32 %v1588_v50, %v1330_v21 }
 0x28d   :  { %1708 = vst.msk [vmem:[%s3731_s3 + $0x158] sm:$0xff] %vm69_vm0, %v1653_v0  ;;  %1715 = vst.msk [vmem:[%s3731_s3 + $0x190] sm:$0xff] %vm69_vm0, %v1660_v55 }
 0x28e   :  { %v1563_v20 = vpop.permute.xlu1 %1562  ;;  %v1598_v7 = vpop.permute.xlu0 %1597 }
 0x28f   :  { %v1655_v41 = vadd.f32 %v1563_v20, %v1325_v1  ;;  %v1662_v10 = vadd.f32 %v1598_v7, %v1332_v38 }
 0x291   :  { %1710 = vst.msk [vmem:[%s3731_s3 + $0x168] sm:$0xff] %vm69_vm0, %v1655_v41  ;;  %1717 = vst.msk [vmem:[%s3731_s3 + $0x1a0] sm:$0xff] %vm69_vm0, %v1662_v10 }
 0x292   :  { %v1573_v44 = vpop.permute.xlu1 %1572  ;;  %v1608_v9 = vpop.permute.xlu0 %1607 }
 0x293   :  { %v1657_v52 = vadd.f32 %v1573_v44, %v1327_v59  ;;  %v1664_v13 = vadd.f32 %v1608_v9, %v1334_v36 }
 0x295   :  { %1712 = vst.msk [vmem:[%s3731_s3 + $0x178] sm:$0xff] %vm69_vm0, %v1657_v52  ;;  %1719 = vst.msk [vmem:[%s3731_s3 + $0x1b0] sm:$0xff] %vm69_vm0, %v1664_v13 }
 0x296   :  { %v1583_v25 = vpop.permute.xlu1 %1582 }
 0x297   :  { %v1659_v37 = vadd.f32 %v1583_v25, %v1329_v42 }
 0x299   :  { %1714 = vst.msk [vmem:[%s3731_s3 + $0x188] sm:$0xff] %vm69_vm0, %v1659_v37 }
 0x29a   :  { %v1593_v58 = vpop.permute.xlu1 %1592 }
 0x29b   :  { %v1661_v51 = vadd.f32 %v1593_v58, %v1331_v53 }
 0x29d   :  { %1716 = vst.msk [vmem:[%s3731_s3 + $0x198] sm:$0xff] %vm69_vm0, %v1661_v51 }
 0x29e   :  { %v1603_v11 = vpop.permute.xlu1 %1602 }
 0x29f   :  { %v1663_v18 = vadd.f32 %v1603_v11, %v1333_v29 }
 0x2a1   :  { %1718 = vst.msk [vmem:[%s3731_s3 + $0x1a8] sm:$0xff] %vm69_vm0, %v1663_v18 }

</bundles_post_ra>
